<compile_context>
chip_gen: v6e
topology: v6e:2x2x1
jax: 0.10.0
libtpu: 0.0.40
codegen_flags: <defaults>
</compile_context>

<pallas_src>
import jax
import jax.numpy as jnp
import numpy as np
from jax import lax
from jax.experimental import pallas as pl
from jax.experimental.pallas import tpu as pltpu


def _round_up(x, n):
    return (x + n - 1) // n * n


def _vmem_capacity_bytes():
    try:
        return int(pltpu.get_tpu_info().vmem_capacity_bytes)
    except Exception:
        return 64 << 20            # conservative (v7x-sized) fallback


def _auto_tm(m, d2p, hp, K, w_bytes, zs_bytes, budget, max_tm):
    """Largest batch-tile (multiple of 8) that fits the VMEM budget."""
    # Worst case: weights double-buffered (if Buffered(1) is unavailable).
    weights = 2 * (K * (d2p * hp + hp * 2 * d2p) * w_bytes
                   + K * (hp + 2 * d2p) * 4)
    per_row = (2 * 2 * d2p * 4           # xh input block, 2 pipeline buffers, f32
               + 2 * 2 * d2p * zs_bytes  # zs output block, 2 pipeline buffers
               + 2 * d2p * 4             # carried z scratch (both halves)
               + 32)                     # log-det block/scratch slack
    avail = max(budget - weights, 8 * per_row)
    tm = (avail // per_row) // 8 * 8
    tm = max(8, min(int(max_tm), int(tm)))
    tm = min(tm, _round_up(m, 8))
    return int(tm)


def _flow_seq_kernel(xh_ref, w1_ref, b1_ref, wst_ref, bst_ref,
                     zs_ref, ld_ref, z_sc, ld_sc):
    k = pl.program_id(1)          # flow index (inner, sequential carry axis)
    d2p = z_sc.shape[-1]

    # New batch tile: load x (pre-split into lane-padded halves by the
    # wrapper) and zero the running log-det accumulator.
    @pl.when(k == 0)
    def _():
        z_sc[...] = xh_ref[...].astype(jnp.float32)
        ld_sc[...] = jnp.zeros_like(ld_sc)

    # Half-swap permutation tracked by flow parity instead of a lane concat:
    # slot `cur` holds the current "x1" half, slot `oth` holds "x2".
    cur = lax.rem(k, 2)
    oth = 1 - cur
    x1 = z_sc[cur]                # (tm, d2p) f32
    x2 = z_sc[oth]                # (tm, d2p) f32

    cdt = w1_ref.dtype            # MXU operand dtype (bf16 on all chips)

    # Coupling net.  Second layer is one fused matmul producing [s | t] side
    # by side (N width = 2*d2p, 128-aligned) with a fused bias.
    h = jnp.tanh(
        jnp.dot(x1.astype(cdt), w1_ref[k], preferred_element_type=jnp.float32)
        + b1_ref[k])
    st = (jnp.dot(h.astype(cdt), wst_ref[k], preferred_element_type=jnp.float32)
          + bst_ref[k])
    s = jnp.tanh(st[:, :d2p])     # padded lanes: tanh(0) = 0
    t = st[:, d2p:]

    z2 = x2 * jnp.exp(s) + t

    # log_det += sum(s) over the feature dim (padded lanes contribute 0).
    ld_sc[...] = ld_sc[...] + jnp.sum(s, axis=-1, keepdims=True)

    # State update (half swap): new first half -> slot `oth`; old x1 (the new
    # second half) stays untouched in slot `cur`.
    z_sc[oth] = z2

    # Intermediate z for this flow: halves written to their own slabs, both at
    # lane offset 0 (unmasked, 128-aligned stores).
    zs_ref[0, 0, :, :] = z2.astype(zs_ref.dtype)
    zs_ref[0, 1, :, :] = x1.astype(zs_ref.dtype)

    @pl.when(k == pl.num_programs(1) - 1)
    def _():
        ld_ref[...] = ld_sc[...]


def normalizing_flow_forward(x, params, *, max_tm=None,
                             matmul_dtype=jnp.bfloat16, zs_dtype=None):
    """Returns (zs, log_det) matching NormalizingFlow.forward semantics.

    zs is a list of length num_flows + 1 with zs[0] == x; log_det has shape (m,).
    """
    W1, b1, Ws, bs, Wt, bt = params
    K, d2, H = W1.shape
    m, d = x.shape
    assert d == 2 * d2

    if zs_dtype is None:
        zs_dtype = x.dtype
    if max_tm is None:
        max_tm = 1024

    # Lane-dense padding of the feature / hidden dims.
    d2p = _round_up(d2, 128)
    hp = _round_up(H, 128)
    dp = 2 * d2p

    # Pad weights with zeros (inert) and fuse the two second-layer weights /
    # biases into one matmul / bias.
    W1c = jnp.pad(W1, ((0, 0), (0, d2p - d2), (0, hp - H))).astype(matmul_dtype)
    b1c = jnp.pad(b1, ((0, 0), (0, hp - H))).reshape(K, 1, hp).astype(jnp.float32)
    Ws_p = jnp.pad(Ws, ((0, 0), (0, hp - H), (0, d2p - d2)))
    Wt_p = jnp.pad(Wt, ((0, 0), (0, hp - H), (0, d2p - d2)))
    Wst = jnp.concatenate([Ws_p, Wt_p], axis=-1).astype(matmul_dtype)   # (K, hp, dp)
    bs_p = jnp.pad(bs, ((0, 0), (0, d2p - d2)))
    bt_p = jnp.pad(bt, ((0, 0), (0, d2p - d2)))
    bst = jnp.concatenate([bs_p, bt_p], axis=-1).reshape(K, 1, dp).astype(jnp.float32)

    # Generation-aware VMEM budget and batch tiling.
    vmem_cap = _vmem_capacity_bytes()
    budget = min(int(0.70 * vmem_cap), 100 << 20)
    tm = _auto_tm(m, d2p, hp, K,
                  jnp.dtype(matmul_dtype).itemsize,
                  jnp.dtype(zs_dtype).itemsize,
                  budget, max_tm)
    m_pad = _round_up(m, tm)

    # x split into halves, each zero-padded to d2p lanes.  Padded lanes stay
    # exactly 0 through every flow, so log_det and the real lanes are exact.
    xh = jnp.zeros((2, m_pad, d2p), jnp.float32)
    xh = xh.at[0, :m, :d2].set(x[:, :d2].astype(jnp.float32))
    xh = xh.at[1, :m, :d2].set(x[:, d2:].astype(jnp.float32))

    grid = (m_pad // tm, K)   # batch tiles outer (parallel), flows inner (carry)

    def _build(weight_pipeline_mode):
        def _wspec(shape):
            kwargs = {}
            if weight_pipeline_mode is not None:
                kwargs["pipeline_mode"] = weight_pipeline_mode
            return pl.BlockSpec(shape, lambda b, k: (0,) * len(shape), **kwargs)

        return pl.pallas_call(
            _flow_seq_kernel,
            out_shape=(jax.ShapeDtypeStruct((K, 2, m_pad, d2p), zs_dtype),
                       jax.ShapeDtypeStruct((m_pad, 1), jnp.float32)),
            grid_spec=pltpu.PrefetchScalarGridSpec(
                num_scalar_prefetch=0,
                grid=grid,
                in_specs=[
                    # x halves, one batch tile per outer grid step.
                    pl.BlockSpec((2, tm, d2p), lambda b, k: (0, b, 0)),
                    # All K flows' weights VMEM-resident once (constant
                    # index_map); indexed by k inside the kernel.
                    _wspec((K, d2p, hp)),
                    _wspec((K, 1, hp)),
                    _wspec((K, hp, dp)),
                    _wspec((K, 1, dp)),
                ],
                out_specs=[
                    pl.BlockSpec((1, 2, tm, d2p), lambda b, k: (k, 0, b, 0)),
                    pl.BlockSpec((tm, 1), lambda b, k: (b, 0)),
                ],
                scratch_shapes=[
                    pltpu.VMEM((2, tm, d2p), jnp.float32),   # carried z halves
                    pltpu.VMEM((tm, 1), jnp.float32),        # carried log_det
                ],
            ),
            compiler_params=pltpu.CompilerParams(
                # Batch tiles are independent (sharded across v7x's two TCs);
                # the flow axis carries state sequentially.
                dimension_semantics=("parallel", "arbitrary"),
                vmem_limit_bytes=int(budget)),
        )

    try:
        # Single-buffer the constant-index weight blocks (halves their VMEM
        # footprint; matters inside v7x's 64 MiB budget).
        zs_stacked, log_det = _build(pl.Buffered(1))(xh, W1c, b1c, Wst, bst)
    except Exception:
        # Fallback if this jax build rejects Buffered(1) on these specs.
        zs_stacked, log_det = _build(None)(xh, W1c, b1c, Wst, bst)

    zs = [x]
    for k in range(K):
        zk = jnp.concatenate(
            [zs_stacked[k, 0, :m, :d2], zs_stacked[k, 1, :m, :d2]], axis=-1)
        zs.append(zk)
    return zs, log_det[:m, 0]


def reference_forward(x, params):
    """Pure-JAX (f32) reference mirroring the PyTorch forward loop."""
    W1, b1, Ws, bs, Wt, bt = params
    K, d2, _ = W1.shape
    m = x.shape[0]
    log_det = jnp.zeros((m,), jnp.float32)
    zs = [x]
    z = x
    for k in range(K):
        x1, x2 = z[:, :d2], z[:, d2:]
        h = jnp.tanh(x1 @ W1[k] + b1[k])
        s = jnp.tanh(h @ Ws[k] + bs[k])
        t = h @ Wt[k] + bt[k]
        z2 = x2 * jnp.exp(s) + t
        log_det = log_det + jnp.sum(s, axis=-1)
        z = jnp.concatenate([z2, x1], axis=-1)
        zs.append(z)
    return zs, log_det


if __name__ == "__main__":
    num_flows = 4
    # Small demo; m is intentionally NOT a tile multiple to exercise batch
    # tiling + padding (max_tm=8 -> grid = (3, 4)); d2/H are padded to 128.
    m, d, hidden = 20, 16, 32
    d2 = d // 2

    key = jax.random.PRNGKey(0)
    kx, k1, k2, k3, k4, k5, k6 = jax.random.split(key, 7)
    x = jax.random.normal(kx, (m, d), jnp.float32)

    params = (
        0.1 * jax.random.normal(k1, (num_flows, d2, hidden), jnp.float32),  # W1
        0.1 * jax.random.normal(k2, (num_flows, hidden), jnp.float32),      # b1
        0.1 * jax.random.normal(k3, (num_flows, hidden, d2), jnp.float32),  # Ws
        0.1 * jax.random.normal(k4, (num_flows, d2), jnp.float32),          # bs
        0.1 * jax.random.normal(k5, (num_flows, hidden, d2), jnp.float32),  # Wt
        0.1 * jax.random.normal(k6, (num_flows, d2), jnp.float32),          # bt
    )

    zs, log_det = normalizing_flow_forward(x, params, max_tm=8)
    jax.block_until_ready(log_det)
    jax.block_until_ready(zs[-1])

    zs_ref, log_det_ref = reference_forward(x, params)
    # bf16 MXU operands vs. the f32 reference -> loosened tolerance.
    tol = 5e-2
    assert len(zs) == num_flows + 1
    for z_p, z_r in zip(zs, zs_ref):
        np.testing.assert_allclose(np.asarray(z_p, dtype=np.float32),
                                   np.asarray(z_r),
                                   rtol=tol, atol=tol)
    np.testing.assert_allclose(np.asarray(log_det), np.asarray(log_det_ref),
                               rtol=tol, atol=tol)

    print("KERNEL_OK")
</pallas_src>

<mosaic_0001>
module attributes {stable_mosaic.version = 11 : i64} {
  func.func @_flow_seq_kernel(%arg0: i32, %arg1: i32, %arg2: memref<2x8x128xf32, #tpu.memory_space<vmem>>, %arg3: memref<4x128x128xbf16, #tpu.memory_space<vmem>>, %arg4: memref<4x1x128xf32, #tpu.memory_space<vmem>>, %arg5: memref<4x128x256xbf16, #tpu.memory_space<vmem>>, %arg6: memref<4x1x256xf32, #tpu.memory_space<vmem>>, %arg7: memref<1x2x8x128xf32, #tpu.memory_space<vmem>>, %arg8: memref<8x1xf32, #tpu.memory_space<vmem>>, %arg9: memref<2x8x128xf32, #tpu.memory_space<vmem>>, %arg10: memref<8x1xf32, #tpu.memory_space<vmem>>) attributes {dimension_semantics = [#tpu.dimension_semantics<parallel>, #tpu.dimension_semantics<arbitrary>], iteration_bounds = array<i64: 3, 4>, scalar_prefetch = 0 : i64, scratch_operands = 2 : i64, tpu.core_type = #tpu.core_type<tc>, window_params = [{transform_indices = @transform_0, window_bounds = array<i64: 2, 8, 128>}, {pipeline_mode = #tpu.pipeline_mode<synchronous>, transform_indices = @transform_1, window_bounds = array<i64: 4, 128, 128>}, {pipeline_mode = #tpu.pipeline_mode<synchronous>, transform_indices = @transform_2, window_bounds = array<i64: 4, 1, 128>}, {pipeline_mode = #tpu.pipeline_mode<synchronous>, transform_indices = @transform_3, window_bounds = array<i64: 4, 128, 256>}, {pipeline_mode = #tpu.pipeline_mode<synchronous>, transform_indices = @transform_4, window_bounds = array<i64: 4, 1, 256>}, {transform_indices = @transform_5, window_bounds = array<i64: 1, 2, 8, 128>}, {transform_indices = @transform_6, window_bounds = array<i64: 8, 1>}]} {
    %c0_i32 = arith.constant 0 : i32
    %0 = arith.cmpi eq, %arg1, %c0_i32 : i32
    %1 = arith.extui %0 : i1 to i32
    %c0_i32_0 = arith.constant 0 : i32
    %2 = arith.cmpi ne, %1, %c0_i32_0 : i32
    scf.if %2 {
      %c0_28 = arith.constant 0 : index
      %c0_29 = arith.constant 0 : index
      %c0_30 = arith.constant 0 : index
      %56 = vector.load %arg2[%c0_28, %c0_29, %c0_30] : memref<2x8x128xf32, #tpu.memory_space<vmem>>, vector<2x8x128xf32>
      %c0_31 = arith.constant 0 : index
      %c0_32 = arith.constant 0 : index
      %c0_33 = arith.constant 0 : index
      %57 = vector.load %arg9[%c0_31, %c0_32, %c0_33] : memref<2x8x128xf32, #tpu.memory_space<vmem>>, vector<2x8x128xf32>
      tpu.vector_store %arg9[%c0_31, %c0_32, %c0_33], %56 {strides = array<i32>} : memref<2x8x128xf32, #tpu.memory_space<vmem>>, vector<2x8x128xf32>,
      %cst_34 = arith.constant 0.000000e+00 : f32
      %58 = vector.broadcast %cst_34 : f32 to vector<8x1xf32>
      %c0_35 = arith.constant 0 : index
      %c0_36 = arith.constant 0 : index
      %59 = vector.load %arg10[%c0_35, %c0_36] : memref<8x1xf32, #tpu.memory_space<vmem>>, vector<8x1xf32>
      tpu.vector_store %arg10[%c0_35, %c0_36], %58 {strides = array<i32>} : memref<8x1xf32, #tpu.memory_space<vmem>>, vector<8x1xf32>,
    } else {
    }
    %c2_i32 = arith.constant 2 : i32
    %3 = arith.remsi %arg1, %c2_i32 : i32
    %c1_i32 = arith.constant 1 : i32
    %4 = arith.subi %c1_i32, %3 : i32
    %5 = arith.index_cast %3 : i32 to index
    %c0 = arith.constant 0 : index
    %c0_1 = arith.constant 0 : index
    %6 = vector.load %arg9[%5, %c0, %c0_1] : memref<2x8x128xf32, #tpu.memory_space<vmem>>, vector<1x8x128xf32>
    %7 = vector.shape_cast %6 : vector<1x8x128xf32> to vector<8x128xf32>
    %8 = arith.index_cast %4 : i32 to index
    %c0_2 = arith.constant 0 : index
    %c0_3 = arith.constant 0 : index
    %9 = vector.load %arg9[%8, %c0_2, %c0_3] : memref<2x8x128xf32, #tpu.memory_space<vmem>>, vector<1x8x128xf32>
    %10 = vector.shape_cast %9 : vector<1x8x128xf32> to vector<8x128xf32>
    %11 = arith.truncf %7 : vector<8x128xf32> to vector<8x128xbf16>
    %12 = arith.index_cast %arg1 : i32 to index
    %c0_4 = arith.constant 0 : index
    %c0_5 = arith.constant 0 : index
    %13 = vector.load %arg3[%12, %c0_4, %c0_5] : memref<4x128x128xbf16, #tpu.memory_space<vmem>>, vector<1x128x128xbf16>
    %14 = vector.shape_cast %13 : vector<1x128x128xbf16> to vector<128x128xbf16>
    %cst = arith.constant dense<0.000000e+00> : vector<8x128xf32>
    %15 = tpu.matmul %11, %14, %cst {dimension_numbers = #tpu.dot_dimension_numbers<[1], [0], [0], [1], [0, 0, 1, 1], [], []>} : vector<8x128xbf16>, vector<128x128xbf16>, vector<8x128xf32> -> vector<8x128xf32>
    %16 = arith.index_cast %arg1 : i32 to index
    %c0_6 = arith.constant 0 : index
    %c0_7 = arith.constant 0 : index
    %17 = vector.load %arg4[%16, %c0_6, %c0_7] : memref<4x1x128xf32, #tpu.memory_space<vmem>>, vector<1x1x128xf32>
    %18 = vector.shape_cast %17 : vector<1x1x128xf32> to vector<1x128xf32>
    %19 = vector.broadcast %18 : vector<1x128xf32> to vector<8x128xf32>
    %20 = arith.addf %15, %19 : vector<8x128xf32>
    %21 = math.tanh %20 : vector<8x128xf32>
    %22 = arith.truncf %21 : vector<8x128xf32> to vector<8x128xbf16>
    %23 = arith.index_cast %arg1 : i32 to index
    %c0_8 = arith.constant 0 : index
    %c0_9 = arith.constant 0 : index
    %24 = vector.load %arg5[%23, %c0_8, %c0_9] : memref<4x128x256xbf16, #tpu.memory_space<vmem>>, vector<1x128x256xbf16>
    %25 = vector.shape_cast %24 : vector<1x128x256xbf16> to vector<128x256xbf16>
    %cst_10 = arith.constant dense<0.000000e+00> : vector<8x256xf32>
    %26 = tpu.matmul %22, %25, %cst_10 {dimension_numbers = #tpu.dot_dimension_numbers<[1], [0], [0], [1], [0, 0, 1, 1], [], []>} : vector<8x128xbf16>, vector<128x256xbf16>, vector<8x256xf32> -> vector<8x256xf32>
    %27 = arith.index_cast %arg1 : i32 to index
    %c0_11 = arith.constant 0 : index
    %c0_12 = arith.constant 0 : index
    %28 = vector.load %arg6[%27, %c0_11, %c0_12] : memref<4x1x256xf32, #tpu.memory_space<vmem>>, vector<1x1x256xf32>
    %29 = vector.shape_cast %28 : vector<1x1x256xf32> to vector<1x256xf32>
    %30 = vector.broadcast %29 : vector<1x256xf32> to vector<8x256xf32>
    %31 = arith.addf %26, %30 : vector<8x256xf32>
    %32 = vector.extract_strided_slice %31 {offsets = [0, 0], sizes = [8, 128], strides = [1, 1]} : vector<8x256xf32> to vector<8x128xf32>
    %33 = math.tanh %32 : vector<8x128xf32>
    %34 = vector.extract_strided_slice %31 {offsets = [0, 128], sizes = [8, 128], strides = [1, 1]} : vector<8x256xf32> to vector<8x128xf32>
    %35 = math.exp %33 : vector<8x128xf32>
    %36 = arith.mulf %10, %35 : vector<8x128xf32>
    %37 = arith.addf %36, %34 : vector<8x128xf32>
    %c0_13 = arith.constant 0 : index
    %c0_14 = arith.constant 0 : index
    %38 = vector.load %arg10[%c0_13, %c0_14] : memref<8x1xf32, #tpu.memory_space<vmem>>, vector<8x1xf32>
    %cst_15 = arith.constant dense<0.000000e+00> : vector<8xf32>
    %39 = vector.multi_reduction <add>, %33, %cst_15 [1] : vector<8x128xf32> to vector<8xf32>
    %40 = vector.shape_cast %39 : vector<8xf32> to vector<8x1xf32>
    %41 = arith.addf %38, %40 : vector<8x1xf32>
    %c0_16 = arith.constant 0 : index
    %c0_17 = arith.constant 0 : index
    %42 = vector.load %arg10[%c0_16, %c0_17] : memref<8x1xf32, #tpu.memory_space<vmem>>, vector<8x1xf32>
    tpu.vector_store %arg10[%c0_16, %c0_17], %41 {strides = array<i32>} : memref<8x1xf32, #tpu.memory_space<vmem>>, vector<8x1xf32>,
    %43 = arith.index_cast %4 : i32 to index
    %c0_18 = arith.constant 0 : index
    %c0_19 = arith.constant 0 : index
    %44 = vector.load %arg9[%43, %c0_18, %c0_19] : memref<2x8x128xf32, #tpu.memory_space<vmem>>, vector<1x8x128xf32>
    %45 = vector.shape_cast %44 : vector<1x8x128xf32> to vector<8x128xf32>
    %46 = vector.shape_cast %37 : vector<8x128xf32> to vector<1x8x128xf32>
    tpu.vector_store %arg9[%43, %c0_18, %c0_19], %46 {strides = array<i32>} : memref<2x8x128xf32, #tpu.memory_space<vmem>>, vector<1x8x128xf32>,
    %c0_20 = arith.constant 0 : index
    %c0_21 = arith.constant 0 : index
    %c0_22 = arith.constant 0 : index
    %c0_23 = arith.constant 0 : index
    %47 = vector.load %arg7[%c0_20, %c0_21, %c0_22, %c0_23] : memref<1x2x8x128xf32, #tpu.memory_space<vmem>>, vector<1x1x8x128xf32>
    %48 = vector.shape_cast %47 : vector<1x1x8x128xf32> to vector<8x128xf32>
    %49 = vector.shape_cast %37 : vector<8x128xf32> to vector<1x1x8x128xf32>
    tpu.vector_store %arg7[%c0_20, %c0_21, %c0_22, %c0_23], %49 {strides = array<i32>} : memref<1x2x8x128xf32, #tpu.memory_space<vmem>>, vector<1x1x8x128xf32>,
    %c0_24 = arith.constant 0 : index
    %c1 = arith.constant 1 : index
    %c0_25 = arith.constant 0 : index
    %c0_26 = arith.constant 0 : index
    %50 = vector.load %arg7[%c0_24, %c1, %c0_25, %c0_26] : memref<1x2x8x128xf32, #tpu.memory_space<vmem>>, vector<1x1x8x128xf32>
    %51 = vector.shape_cast %50 : vector<1x1x8x128xf32> to vector<8x128xf32>
    %52 = vector.shape_cast %7 : vector<8x128xf32> to vector<1x1x8x128xf32>
    tpu.vector_store %arg7[%c0_24, %c1, %c0_25, %c0_26], %52 {strides = array<i32>} : memref<1x2x8x128xf32, #tpu.memory_space<vmem>>, vector<1x1x8x128xf32>,
    %c3_i32 = arith.constant 3 : i32
    %53 = arith.cmpi eq, %arg1, %c3_i32 : i32
    %54 = arith.extui %53 : i1 to i32
    %c0_i32_27 = arith.constant 0 : i32
    %55 = arith.cmpi ne, %54, %c0_i32_27 : i32
    scf.if %55 {
      %c0_28 = arith.constant 0 : index
      %c0_29 = arith.constant 0 : index
      %56 = vector.load %arg10[%c0_28, %c0_29] : memref<8x1xf32, #tpu.memory_space<vmem>>, vector<8x1xf32>
      %c0_30 = arith.constant 0 : index
      %c0_31 = arith.constant 0 : index
      %57 = vector.load %arg8[%c0_30, %c0_31] : memref<8x1xf32, #tpu.memory_space<vmem>>, vector<8x1xf32>
      tpu.vector_store %arg8[%c0_30, %c0_31], %56 {strides = array<i32>} : memref<8x1xf32, #tpu.memory_space<vmem>>, vector<8x1xf32>,
    } else {
    }
    return
  }
  func.func @transform_0(%arg0: i32, %arg1: i32) -> (i32, i32, i32) {
    %c0_i32 = arith.constant 0 : i32
    %c0_i32_0 = arith.constant 0 : i32
    %c0_i32_1 = arith.constant 0 : i32
    return %c0_i32, %arg0, %c0_i32_0 : i32, i32, i32
  }
  func.func @transform_1(%arg0: i32, %arg1: i32) -> (i32, i32, i32) {
    %c0_i32 = arith.constant 0 : i32
    %c0_i32_0 = arith.constant 0 : i32
    %c0_i32_1 = arith.constant 0 : i32
    %c0_i32_2 = arith.constant 0 : i32
    return %c0_i32, %c0_i32_0, %c0_i32_1 : i32, i32, i32
  }
  func.func @transform_2(%arg0: i32, %arg1: i32) -> (i32, i32, i32) {
    %c0_i32 = arith.constant 0 : i32
    %c0_i32_0 = arith.constant 0 : i32
    %c0_i32_1 = arith.constant 0 : i32
    %c0_i32_2 = arith.constant 0 : i32
    return %c0_i32, %c0_i32_0, %c0_i32_1 : i32, i32, i32
  }
  func.func @transform_3(%arg0: i32, %arg1: i32) -> (i32, i32, i32) {
    %c0_i32 = arith.constant 0 : i32
    %c0_i32_0 = arith.constant 0 : i32
    %c0_i32_1 = arith.constant 0 : i32
    %c0_i32_2 = arith.constant 0 : i32
    return %c0_i32, %c0_i32_0, %c0_i32_1 : i32, i32, i32
  }
  func.func @transform_4(%arg0: i32, %arg1: i32) -> (i32, i32, i32) {
    %c0_i32 = arith.constant 0 : i32
    %c0_i32_0 = arith.constant 0 : i32
    %c0_i32_1 = arith.constant 0 : i32
    %c0_i32_2 = arith.constant 0 : i32
    return %c0_i32, %c0_i32_0, %c0_i32_1 : i32, i32, i32
  }
  func.func @transform_5(%arg0: i32, %arg1: i32) -> (i32, i32, i32, i32) {
    %c0_i32 = arith.constant 0 : i32
    %c0_i32_0 = arith.constant 0 : i32
    %c0_i32_1 = arith.constant 0 : i32
    return %arg1, %c0_i32, %arg0, %c0_i32_0 : i32, i32, i32, i32
  }
  func.func @transform_6(%arg0: i32, %arg1: i32) -> (i32, i32) {
    %c0_i32 = arith.constant 0 : i32
    %c0_i32_0 = arith.constant 0 : i32
    return %arg0, %c0_i32 : i32, i32
  }
}

module attributes {stable_mosaic.version = 11 : i64} {
  func.func @_flow_seq_kernel(%arg0: i32, %arg1: i32, %arg2: memref<2x8x128xf32, #tpu.memory_space<vmem>>, %arg3: memref<4x128x128xbf16, #tpu.memory_space<vmem>>, %arg4: memref<4x1x128xf32, #tpu.memory_space<vmem>>, %arg5: memref<4x128x256xbf16, #tpu.memory_space<vmem>>, %arg6: memref<4x1x256xf32, #tpu.memory_space<vmem>>, %arg7: memref<1x2x8x128xf32, #tpu.memory_space<vmem>>, %arg8: memref<8x1xf32, #tpu.memory_space<vmem>>, %arg9: memref<2x8x128xf32, #tpu.memory_space<vmem>>, %arg10: memref<8x1xf32, #tpu.memory_space<vmem>>) attributes {dimension_semantics = [#tpu.dimension_semantics<parallel>, #tpu.dimension_semantics<arbitrary>], iteration_bounds = array<i64: 3, 4>, scalar_prefetch = 0 : i64, scratch_operands = 2 : i64, tpu.core_type = #tpu.core_type<tc>, window_params = [{transform_indices = @transform_0, window_bounds = array<i64: 2, 8, 128>}, {pipeline_mode = #tpu.pipeline_mode<synchronous>, transform_indices = @transform_1, window_bounds = array<i64: 4, 128, 128>}, {pipeline_mode = #tpu.pipeline_mode<synchronous>, transform_indices = @transform_2, window_bounds = array<i64: 4, 1, 128>}, {pipeline_mode = #tpu.pipeline_mode<synchronous>, transform_indices = @transform_3, window_bounds = array<i64: 4, 128, 256>}, {pipeline_mode = #tpu.pipeline_mode<synchronous>, transform_indices = @transform_4, window_bounds = array<i64: 4, 1, 256>}, {transform_indices = @transform_5, window_bounds = array<i64: 1, 2, 8, 128>}, {transform_indices = @transform_6, window_bounds = array<i64: 8, 1>}]} {
    %c0_i32 = arith.constant 0 : i32
    %0 = arith.cmpi eq, %arg1, %c0_i32 : i32
    %1 = arith.extui %0 : i1 to i32
    %c0_i32_0 = arith.constant 0 : i32
    %2 = arith.cmpi ne, %1, %c0_i32_0 : i32
    scf.if %2 {
      %c0_28 = arith.constant 0 : index
      %c0_29 = arith.constant 0 : index
      %c0_30 = arith.constant 0 : index
      %56 = vector.load %arg2[%c0_28, %c0_29, %c0_30] : memref<2x8x128xf32, #tpu.memory_space<vmem>>, vector<2x8x128xf32>
      %c0_31 = arith.constant 0 : index
      %c0_32 = arith.constant 0 : index
      %c0_33 = arith.constant 0 : index
      %57 = vector.load %arg9[%c0_31, %c0_32, %c0_33] : memref<2x8x128xf32, #tpu.memory_space<vmem>>, vector<2x8x128xf32>
      tpu.vector_store %arg9[%c0_31, %c0_32, %c0_33], %56 {strides = array<i32>} : memref<2x8x128xf32, #tpu.memory_space<vmem>>, vector<2x8x128xf32>,
      %cst_34 = arith.constant 0.000000e+00 : f32
      %58 = vector.broadcast %cst_34 : f32 to vector<8x1xf32>
      %c0_35 = arith.constant 0 : index
      %c0_36 = arith.constant 0 : index
      %59 = vector.load %arg10[%c0_35, %c0_36] : memref<8x1xf32, #tpu.memory_space<vmem>>, vector<8x1xf32>
      tpu.vector_store %arg10[%c0_35, %c0_36], %58 {strides = array<i32>} : memref<8x1xf32, #tpu.memory_space<vmem>>, vector<8x1xf32>,
    } else {
    }
    %c2_i32 = arith.constant 2 : i32
    %3 = arith.remsi %arg1, %c2_i32 : i32
    %c1_i32 = arith.constant 1 : i32
    %4 = arith.subi %c1_i32, %3 : i32
    %5 = arith.index_cast %3 : i32 to index
    %c0 = arith.constant 0 : index
    %c0_1 = arith.constant 0 : index
    %6 = vector.load %arg9[%5, %c0, %c0_1] : memref<2x8x128xf32, #tpu.memory_space<vmem>>, vector<1x8x128xf32>
    %7 = vector.shape_cast %6 : vector<1x8x128xf32> to vector<8x128xf32>
    %8 = arith.index_cast %4 : i32 to index
    %c0_2 = arith.constant 0 : index
    %c0_3 = arith.constant 0 : index
    %9 = vector.load %arg9[%8, %c0_2, %c0_3] : memref<2x8x128xf32, #tpu.memory_space<vmem>>, vector<1x8x128xf32>
    %10 = vector.shape_cast %9 : vector<1x8x128xf32> to vector<8x128xf32>
    %11 = arith.truncf %7 : vector<8x128xf32> to vector<8x128xbf16>
    %12 = arith.index_cast %arg1 : i32 to index
    %c0_4 = arith.constant 0 : index
    %c0_5 = arith.constant 0 : index
    %13 = vector.load %arg3[%12, %c0_4, %c0_5] : memref<4x128x128xbf16, #tpu.memory_space<vmem>>, vector<1x128x128xbf16>
    %14 = vector.shape_cast %13 : vector<1x128x128xbf16> to vector<128x128xbf16>
    %cst = arith.constant dense<0.000000e+00> : vector<8x128xf32>
    %15 = tpu.matmul %11, %14, %cst {dimension_numbers = #tpu.dot_dimension_numbers<[1], [0], [0], [1], [0, 0, 1, 1], [], []>} : vector<8x128xbf16>, vector<128x128xbf16>, vector<8x128xf32> -> vector<8x128xf32>
    %16 = arith.index_cast %arg1 : i32 to index
    %c0_6 = arith.constant 0 : index
    %c0_7 = arith.constant 0 : index
    %17 = vector.load %arg4[%16, %c0_6, %c0_7] : memref<4x1x128xf32, #tpu.memory_space<vmem>>, vector<1x1x128xf32>
    %18 = vector.shape_cast %17 : vector<1x1x128xf32> to vector<1x128xf32>
    %19 = vector.broadcast %18 : vector<1x128xf32> to vector<8x128xf32>
    %20 = arith.addf %15, %19 : vector<8x128xf32>
    %21 = math.tanh %20 : vector<8x128xf32>
    %22 = arith.truncf %21 : vector<8x128xf32> to vector<8x128xbf16>
    %23 = arith.index_cast %arg1 : i32 to index
    %c0_8 = arith.constant 0 : index
    %c0_9 = arith.constant 0 : index
    %24 = vector.load %arg5[%23, %c0_8, %c0_9] : memref<4x128x256xbf16, #tpu.memory_space<vmem>>, vector<1x128x256xbf16>
    %25 = vector.shape_cast %24 : vector<1x128x256xbf16> to vector<128x256xbf16>
    %cst_10 = arith.constant dense<0.000000e+00> : vector<8x256xf32>
    %26 = tpu.matmul %22, %25, %cst_10 {dimension_numbers = #tpu.dot_dimension_numbers<[1], [0], [0], [1], [0, 0, 1, 1], [], []>} : vector<8x128xbf16>, vector<128x256xbf16>, vector<8x256xf32> -> vector<8x256xf32>
    %27 = arith.index_cast %arg1 : i32 to index
    %c0_11 = arith.constant 0 : index
    %c0_12 = arith.constant 0 : index
    %28 = vector.load %arg6[%27, %c0_11, %c0_12] : memref<4x1x256xf32, #tpu.memory_space<vmem>>, vector<1x1x256xf32>
    %29 = vector.shape_cast %28 : vector<1x1x256xf32> to vector<1x256xf32>
    %30 = vector.broadcast %29 : vector<1x256xf32> to vector<8x256xf32>
    %31 = arith.addf %26, %30 : vector<8x256xf32>
    %32 = vector.extract_strided_slice %31 {offsets = [0, 0], sizes = [8, 128], strides = [1, 1]} : vector<8x256xf32> to vector<8x128xf32>
    %33 = math.tanh %32 : vector<8x128xf32>
    %34 = vector.extract_strided_slice %31 {offsets = [0, 128], sizes = [8, 128], strides = [1, 1]} : vector<8x256xf32> to vector<8x128xf32>
    %35 = math.exp %33 : vector<8x128xf32>
    %36 = arith.mulf %10, %35 : vector<8x128xf32>
    %37 = arith.addf %36, %34 : vector<8x128xf32>
    %c0_13 = arith.constant 0 : index
    %c0_14 = arith.constant 0 : index
    %38 = vector.load %arg10[%c0_13, %c0_14] : memref<8x1xf32, #tpu.memory_space<vmem>>, vector<8x1xf32>
    %cst_15 = arith.constant dense<0.000000e+00> : vector<8xf32>
    %39 = vector.multi_reduction <add>, %33, %cst_15 [1] : vector<8x128xf32> to vector<8xf32>
    %40 = vector.shape_cast %39 : vector<8xf32> to vector<8x1xf32>
    %41 = arith.addf %38, %40 : vector<8x1xf32>
    %c0_16 = arith.constant 0 : index
    %c0_17 = arith.constant 0 : index
    %42 = vector.load %arg10[%c0_16, %c0_17] : memref<8x1xf32, #tpu.memory_space<vmem>>, vector<8x1xf32>
    tpu.vector_store %arg10[%c0_16, %c0_17], %41 {strides = array<i32>} : memref<8x1xf32, #tpu.memory_space<vmem>>, vector<8x1xf32>,
    %43 = arith.index_cast %4 : i32 to index
    %c0_18 = arith.constant 0 : index
    %c0_19 = arith.constant 0 : index
    %44 = vector.load %arg9[%43, %c0_18, %c0_19] : memref<2x8x128xf32, #tpu.memory_space<vmem>>, vector<1x8x128xf32>
    %45 = vector.shape_cast %44 : vector<1x8x128xf32> to vector<8x128xf32>
    %46 = vector.shape_cast %37 : vector<8x128xf32> to vector<1x8x128xf32>
    tpu.vector_store %arg9[%43, %c0_18, %c0_19], %46 {strides = array<i32>} : memref<2x8x128xf32, #tpu.memory_space<vmem>>, vector<1x8x128xf32>,
    %c0_20 = arith.constant 0 : index
    %c0_21 = arith.constant 0 : index
    %c0_22 = arith.constant 0 : index
    %c0_23 = arith.constant 0 : index
    %47 = vector.load %arg7[%c0_20, %c0_21, %c0_22, %c0_23] : memref<1x2x8x128xf32, #tpu.memory_space<vmem>>, vector<1x1x8x128xf32>
    %48 = vector.shape_cast %47 : vector<1x1x8x128xf32> to vector<8x128xf32>
    %49 = vector.shape_cast %37 : vector<8x128xf32> to vector<1x1x8x128xf32>
    tpu.vector_store %arg7[%c0_20, %c0_21, %c0_22, %c0_23], %49 {strides = array<i32>} : memref<1x2x8x128xf32, #tpu.memory_space<vmem>>, vector<1x1x8x128xf32>,
    %c0_24 = arith.constant 0 : index
    %c1 = arith.constant 1 : index
    %c0_25 = arith.constant 0 : index
    %c0_26 = arith.constant 0 : index
    %50 = vector.load %arg7[%c0_24, %c1, %c0_25, %c0_26] : memref<1x2x8x128xf32, #tpu.memory_space<vmem>>, vector<1x1x8x128xf32>
    %51 = vector.shape_cast %50 : vector<1x1x8x128xf32> to vector<8x128xf32>
    %52 = vector.shape_cast %7 : vector<8x128xf32> to vector<1x1x8x128xf32>
    tpu.vector_store %arg7[%c0_24, %c1, %c0_25, %c0_26], %52 {strides = array<i32>} : memref<1x2x8x128xf32, #tpu.memory_space<vmem>>, vector<1x1x8x128xf32>,
    %c3_i32 = arith.constant 3 : i32
    %53 = arith.cmpi eq, %arg1, %c3_i32 : i32
    %54 = arith.extui %53 : i1 to i32
    %c0_i32_27 = arith.constant 0 : i32
    %55 = arith.cmpi ne, %54, %c0_i32_27 : i32
    scf.if %55 {
      %c0_28 = arith.constant 0 : index
      %c0_29 = arith.constant 0 : index
      %56 = vector.load %arg10[%c0_28, %c0_29] : memref<8x1xf32, #tpu.memory_space<vmem>>, vector<8x1xf32>
      %c0_30 = arith.constant 0 : index
      %c0_31 = arith.constant 0 : index
      %57 = vector.load %arg8[%c0_30, %c0_31] : memref<8x1xf32, #tpu.memory_space<vmem>>, vector<8x1xf32>
      tpu.vector_store %arg8[%c0_30, %c0_31], %56 {strides = array<i32>} : memref<8x1xf32, #tpu.memory_space<vmem>>, vector<8x1xf32>,
    } else {
    }
    return
  }
  func.func @transform_0(%arg0: i32, %arg1: i32) -> (i32, i32, i32) {
    %c0_i32 = arith.constant 0 : i32
    %c0_i32_0 = arith.constant 0 : i32
    %c0_i32_1 = arith.constant 0 : i32
    return %c0_i32, %arg0, %c0_i32_0 : i32, i32, i32
  }
  func.func @transform_1(%arg0: i32, %arg1: i32) -> (i32, i32, i32) {
    %c0_i32 = arith.constant 0 : i32
    %c0_i32_0 = arith.constant 0 : i32
    %c0_i32_1 = arith.constant 0 : i32
    %c0_i32_2 = arith.constant 0 : i32
    return %c0_i32, %c0_i32_0, %c0_i32_1 : i32, i32, i32
  }
  func.func @transform_2(%arg0: i32, %arg1: i32) -> (i32, i32, i32) {
    %c0_i32 = arith.constant 0 : i32
    %c0_i32_0 = arith.constant 0 : i32
    %c0_i32_1 = arith.constant 0 : i32
    %c0_i32_2 = arith.constant 0 : i32
    return %c0_i32, %c0_i32_0, %c0_i32_1 : i32, i32, i32
  }
  func.func @transform_3(%arg0: i32, %arg1: i32) -> (i32, i32, i32) {
    %c0_i32 = arith.constant 0 : i32
    %c0_i32_0 = arith.constant 0 : i32
    %c0_i32_1 = arith.constant 0 : i32
    %c0_i32_2 = arith.constant 0 : i32
    return %c0_i32, %c0_i32_0, %c0_i32_1 : i32, i32, i32
  }
  func.func @transform_4(%arg0: i32, %arg1: i32) -> (i32, i32, i32) {
    %c0_i32 = arith.constant 0 : i32
    %c0_i32_0 = arith.constant 0 : i32
    %c0_i32_1 = arith.constant 0 : i32
    %c0_i32_2 = arith.constant 0 : i32
    return %c0_i32, %c0_i32_0, %c0_i32_1 : i32, i32, i32
  }
  func.func @transform_5(%arg0: i32, %arg1: i32) -> (i32, i32, i32, i32) {
    %c0_i32 = arith.constant 0 : i32
    %c0_i32_0 = arith.constant 0 : i32
    %c0_i32_1 = arith.constant 0 : i32
    return %arg1, %c0_i32, %arg0, %c0_i32_0 : i32, i32, i32, i32
  }
  func.func @transform_6(%arg0: i32, %arg1: i32) -> (i32, i32) {
    %c0_i32 = arith.constant 0 : i32
    %c0_i32_0 = arith.constant 0 : i32
    return %arg0, %c0_i32 : i32, i32
  }
}

</mosaic_0001>

<bundles_post_ra>
// kernel: tpu_custom_call.1
= control target key start
LH: loop header
LB: loop body
LE: loop exit
PB: predicated region body
PF: predicated region fallthrough
CT: control target
= control target key end

     0   :  { %s1778_s0 = inlined_call_operand.hbm [shape: f32[2,24,128], index: 0, kind: input, shape index: {}]   ;;  %s1779_s1 = inlined_call_operand.hbm [shape: bf16[4,128,128], index: 1, kind: input, shape index: {}]   ;;  %s1780_s2 = inlined_call_operand.hbm [shape: f32[4,1,128], index: 2, kind: input, shape index: {}]   ;;  %s1781_s3 = inlined_call_operand.hbm [shape: bf16[4,128,256], index: 3, kind: input, shape index: {}]   ;;  %s1782_s4 = inlined_call_operand.hbm [shape: f32[4,1,256], index: 4, kind: input, shape index: {}]   ;;  %s1783_s5 = inlined_call_operand.hbm [shape: f32[4,2,24,128], index: 5, kind: output, shape index: {0}]   ;;  %s1784_s6 = inlined_call_operand.vmem [shape: f32[24,1], index: 6, kind: output, shape index: {1}]  }
   0x1   :  { %1797 = sst [smem:[#allocation23_spill]] %s1779_s1 }
   0x2   :  { %1798 = sst [smem:[#allocation24_spill]] %s1780_s2 }
   0x3   :  { %1799 = sst [smem:[#allocation25_spill]] %s1781_s3 }
   0x4   :  { %1800 = sst [smem:[#allocation26_spill]] %s1782_s4 }
   0x5   :  { %1801 = sst [smem:[#allocation27_spill]] %s1783_s5 }
   0x6   :  { %12 = vsyncpa [#allocation5], 0 }
   0x7   :  { %14 = vsyncpa [#allocation5 + $0x1], 0 }
   0x8   :  { %15 = vsyncpa [#allocation8], 0 }
   0x9   :  { %16 = vsyncpa [#allocation11], 0 }
   0xa   :  { %17 = vsyncpa [#allocation6], 0 }
   0xb   :  { %19 = vsyncpa [#allocation6 + $0x1], 0  ;;  %s1456_s21 = smov 0   ;;  %s1458_s22 = smov 0  }
   0xc   :  { %s1460_s23 = smov 0   ;;  %s1462_s24 = smov 0  }
   0xd   :  { %s1464_s25 = smov 0   ;;  %s1466_s26 = smov 0  }
   0xe   :  { %s1468_s27 = smov 0   ;;  %s1470_s28 = smov 0  }
   0xf   :  { %s1472_s29 = smov 0   ;;  %s1474_s30 = smov 0  }
  0x10   :  { %s1476_s7 = smov 0  }
  0x11 LB: > { %1802 = sst [smem:[#allocation18_spill]] %s1357_s21  ;;  %s850_s8 = sadd.s32 4294967295, %s1397_s7   ;;  %s1397_s7 = sphi %s1476_s7, %s25_s7   ;;  %s1393_s30 = sphi %s1474_s30, %s1839_s30   ;;  %s1389_s29 = sphi %s1472_s29, %s1838_s29   ;;  %s1385_s28 = sphi %s1470_s28, %s1837_s28   ;;  %s1381_s27 = sphi %s1468_s27, %s1829_s27   ;;  %s1377_s26 = sphi %s1466_s26, %s1836_s26   ;;  %s1373_s25 = sphi %s1464_s25, %s1835_s25   ;;  %s1369_s24 = sphi %s1462_s24, %s1834_s24   ;;  %s1365_s23 = sphi %s1460_s23, %s1833_s23   ;;  %s1361_s22 = sphi %s1458_s22, %s1832_s22   ;;  %s1357_s21 = sphi %s1456_s21, %s1831_s21  }
  0x12   : > { %1803 = sst [smem:[#allocation19_spill]] %s1389_s29  ;;  %s851_s9 = sadd.s32 4294967294, %s1397_s7  }
  0x13   : > { %p57_p0 = scmp.ne.s32.totalorder %s1373_s25, %s1369_s24  ;;  %p1512_p1 = scmp.eq.s32.totalorder %s850_s8, 0 }
  0x14   : > { %p166_p2 = scmp.ne.s32.totalorder %s1365_s23, %s1361_s22  ;;  %p167_p4 = scmp.eq.s32.totalorder %s850_s8, 11 }
  0x15   : > { %s1804_s10 = scalar_select %p1512_p1, 1, 0 }
  0x16   : > { %p1521_p3 = por %p1512_p1, %p57_p0  ;;  %p172_p5 = scmp.ne.s32.totalorder %s1361_s22, %s1357_s21 }
  0x17   : > { %p173_p6 = scmp.eq.s32.totalorder %s851_s9, 11  ;;  %p1527_p7 = por %p167_p4, %p166_p2 }
  0x18   : > { %p852_p8 = scmp.ge.s32.totalorder %s1397_s7, 1  ;;  %p206_p10 = scmp.lt.s32.totalorder %s1397_s7, 13 }
  0x19   : > { %s1806_s13 = scalar_select %p1527_p7, 1, 0 }
  0x1a   : > { %p1532_p9 = por %p173_p6, %p172_p5  ;;  %p1537_p11 = pnand %p852_p8, %p206_p10 }
  0x1b   : > { %1807 = sst [smem:[#allocation20_spill]] %s1806_s13  ;;  %s1399_s16 = smov [#allocation7]  }
  0x1c   : > { %s1808_s14 = scalar_select %p1532_p9, 1, 0 }
  0x1d   : > { %s218_s17 = sshll.u32 %s1399_s16, 4  ;;  %p960_p12 = pneg %p1537_p11  ;;  %s219_s17 = int_to_ptr.vmem [resolvable:$true] %s218_s17 }
  0x1e   : > { %1809 = sst [smem:[#allocation21_spill]] %s1808_s14  ;;  %s1400_s19 = smov [#allocation10]  }
  0x1f   : > { %p1545_p13 = pnand %p960_p12, %p1512_p1  ;;  %s244_s20 = sshll.u32 %s1400_s19, 4  ;;  %s245_s20 = int_to_ptr.vmem [resolvable:$true] %s244_s20 }
  0x20   : > { %s1148_s24 = scalar_lea.vmem %s219_s17, 4096  ;;  %p1156_p6 = scmp.lt.s32.totalorder %s219_s17, %s219_s17 }
  0x21   : > { %p1139_p0 = pneg %p1545_p13  ;;  %p1149_p2 = scmp.ne.s32.totalorder %s219_s17, %s1148_s24 }
  0x22   : > { %p1157_p8 = scmp.lt.s32.totalorder %s1148_s24, %s1148_s24 }
  0x23   : > { %p1151_p4 = pnand %p1149_p2, %p1139_p0 }
  0x24   : > { %p1158_p10 = por %p1157_p8, %p1156_p6 }
  0x25   : > { %p1152_p5 = pneg %p1151_p4 }
  0x27   : > { %p1159_p12 = pnand %p1158_p10, %p1152_p5 }
  0x29   : > { %1162 = shalt.err (!%p1159_p12)
}
  0x2a   : > { %s1401_s8 = smov 64   ;;  %s1402_s9 = smov 4  }
  0x2b   : > { %s1812_s1 = sld [smem:[#allocation23_spill]]  ;;  %s1174_s11 = scalar_lea.vmem %s245_s20, 8192 }
  0x2c   : > { %p1175_p9 = scmp.ne.s32.totalorder %s245_s20, %s1174_s11  ;;  %p1182_p7 = scmp.lt.s32.totalorder %s245_s20, %s245_s20 }
  0x2d   : > { %p1183_p1 = scmp.lt.s32.totalorder %s1174_s11, %s1174_s11 }
  0x2e   : > { %p1177_p2 = pnand %p1175_p9, %p1139_p0 }
  0x2f   : > { %p1184_p6 = por %p1183_p1, %p1182_p7 }
  0x30   : > { %p1178_p4 = pneg %p1177_p2 }
  0x31   : > { %963 = dma.hbm_to_vmem [thread:$0]  (!%p1545_p13), %s1812_s1, 4096, %s219_s17, [#allocation8], %s1401_s8, %s1401_s8, %s1402_s9  }
  0x32   : > { %p1185_p5 = pnand %p1184_p6, %p1178_p4 }
  0x34   : > { %1188 = shalt.err (!%p1185_p5)
}
  0x35   : > { %s1789_s24 = smov 128   ;;  %s1790_s14 = smov 8  }
  0x36   : > { %s1813_s3 = sld [smem:[#allocation25_spill]]  ;;  %s1405_s9 = smov [#allocation9]  }
  0x37   : > { %s231_s16 = sshll.u32 %s1405_s9, 4  ;;  %s232_s16 = int_to_ptr.vmem [resolvable:$true] %s231_s16 }
  0x38   : > { %s1200_s19 = scalar_lea.vmem %s232_s16, 64  ;;  %p1208_p8 = scmp.lt.s32.totalorder %s232_s16, %s232_s16 }
  0x39   : > { %p1201_p9 = scmp.ne.s32.totalorder %s232_s16, %s1200_s19  ;;  %p1209_p10 = scmp.lt.s32.totalorder %s1200_s19, %s1200_s19 }
  0x3b   : > { %p1203_p1 = pnand %p1201_p9, %p1139_p0  ;;  %p1210_p12 = por %p1209_p10, %p1208_p8 }
  0x3c   : > { %969 = dma.hbm_to_vmem [thread:$0]  (!%p1545_p13), %s1813_s3, 8192, %s245_s20, [#allocation11], %s1789_s24, %s1789_s24, %s1790_s14  }
  0x3d   : > { %p1204_p7 = pneg %p1203_p1 }
  0x3f   : > { %p1211_p2 = pnand %p1210_p12, %p1204_p7 }
  0x41   : > { %1214 = shalt.err (!%p1211_p2)
}
  0x42   : > { %s1406_s11 = smov 16   ;;  %s1407_s1 = smov 1  }
  0x43   : > { %s1814_s2 = sld [smem:[#allocation24_spill]]  ;;  %s1408_s8 = smov [#allocation12]  }
  0x44   : > { %s257_s9 = sshll.u32 %s1408_s8, 4  ;;  %s258_s9 = int_to_ptr.vmem [resolvable:$true] %s257_s9 }
  0x45   : > { %s1226_s24 = scalar_lea.vmem %s258_s9, 128  ;;  %p1234_p9 = scmp.lt.s32.totalorder %s258_s9, %s258_s9 }
  0x46   : > { %p1227_p4 = scmp.ne.s32.totalorder %s258_s9, %s1226_s24  ;;  %p1235_p1 = scmp.lt.s32.totalorder %s1226_s24, %s1226_s24 }
  0x48   : > { %p1229_p6 = pnand %p1227_p4, %p1139_p0  ;;  %p1236_p7 = por %p1235_p1, %p1234_p9 }
  0x49   : > { %966 = dma.hbm_to_vmem [thread:$0]  (!%p1545_p13), %s1814_s2, 64, %s232_s16, [#allocation8], %s1406_s11, %s1406_s11, %s1407_s1  }
  0x4a   : > { %p1230_p5 = pneg %p1229_p6 }
  0x4c   : > { %p1237_p8 = pnand %p1236_p7, %p1230_p5 }
  0x4e   : > { %1240 = shalt.err (!%p1237_p8)
}
  0x4f   : > { %s1409_s19 = smov 32   ;;  %s1410_s1 = smov 2  }
  0x50   : > { %s1815_s4 = sld [smem:[#allocation26_spill]]  ;;  %s34_s11 = sadd.s32 1, %s1389_s29 }
  0x51   : > { %s37_s20 = sadd.s32 1, %s1393_s30  ;;  %p35_p0 = scmp.ge.s32.totalorder %s34_s11, 4 }
  0x52   : > { %s44_s17 = sadd.s32 1, %s1377_s26  ;;  %p51_p10 = scmp.ne.s32.totalorder %s1377_s26, %s1373_s25 }
  0x53   : > { %p52_p12 = scmp.eq.s32.totalorder %s1397_s7, 0  ;;  %s1841_s11 = smov (%p35_p0, %s34_s11), 0 }
  0x54   : > { %1816 = sst [smem:[#allocation22_spill]] %s1841_s11  ;;  %s1843_s20 = smov (!%p35_p0, %s37_s20), %s1393_s30 }
  0x55   : > { %p1595_p2 = por %p52_p12, %p51_p10  ;;  %s151_s8 = ssub.s32 %s1389_s29, %s1841_s11 }
  0x56   : > { %972 = dma.hbm_to_vmem [thread:$0]  (!%p1545_p13), %s1815_s4, 128, %s258_s9, [#allocation11], %s1409_s19, %s1409_s19, %s1410_s1  }
  0x57   : > { %p39_p13 = scmp.ge.s32.totalorder %s1843_s20, 3  ;;  %p985_p4 = scmp.lt.s32.totalorder %s1397_s7, 12 }
  0x58   : > { %s271_s9 = sand.u32 1, %s1377_s26   ;;  %s859_s19 = sshll.u32 %s1393_s30, 7 }
  0x59   : > { %s1845_s20 = smov (%p39_p13, %s1843_s20), 0  ;;  %s858_s1 = sshll.u32 %s271_s9, 4 }
  0x5a   : > { %s41_s16 = ssub.s32 %s1393_s30, %s1845_s20  ;;  %s280_s3 = scalar_lea.hbm %s1778_s0, %s859_s19 }
  0x5b   : > { %p42_p6 = scmp.eq.s32.totalorder %s41_s16, 0  ;;  %s153_s24 = sor.u32 %s151_s8, %s41_s16 }
  0x5c   : > { %p154_p5 = scmp.eq.s32.totalorder %s153_s24, 0  ;;  %s1818_s11 = sadd.s32 1, %s1365_s23 }
  0x5d   : > { %s1612_s4 = scalar_select %p42_p6, %s1377_s26, %s44_s17  }
  0x5e   : > { %s1617_s29 = scalar_select %p154_p5, %s1365_s23, %s1818_s11  }
  0x5f   : > { %s275_s21 = scalar_lea.vmem [#allocation4], %s858_s1  ;;  %p1623_p9 = pnand %p985_p4, %p1595_p2 }
  0x60   : > { %s281_s5 = sshll.u32 %s275_s21, 4  ;;  %s272_s8 = scalar_lea.sflag [#allocation5], %s271_s9  ;;  %s282_s5 = int_to_ptr.vmem [resolvable:$true] %s281_s5 }
  0x61   : > { %p1243_p1 = pneg %p1623_p9  ;;  %s1254_s2 = scalar_lea.vmem %s282_s5, 256 }
  0x62   : > { %p1255_p7 = scmp.ne.s32.totalorder %s282_s5, %s1254_s2  ;;  %s1411_s14 = smov [#allocation4]  }
  0x63   : > { %s1259_s11 = sshll.u32 %s1411_s14, 4  ;;  %s1260_s11 = int_to_ptr.vmem [resolvable:$false] %s1259_s11 }
  0x64   : > { %p1257_p8 = pnand %p1255_p7, %p1243_p1  ;;  %s1261_s17 = scalar_lea.vmem %s1260_s11, 512 }
  0x65   : > { %p1262_p10 = scmp.lt.s32.totalorder %s282_s5, %s1260_s11  ;;  %p1263_p12 = scmp.lt.s32.totalorder %s1261_s17, %s1254_s2 }
  0x66   : > { %p1258_p0 = pneg %p1257_p8 }
  0x67   : > { %p1264_p13 = por %p1263_p12, %p1262_p10 }
  0x69   : > { %p1265_p2 = pnand %p1264_p13, %p1258_p0 }
  0x6b   : > { %1268 = shalt.err (!%p1265_p2)
}
  0x6c   : > { %s1412_s21 = smov 384   ;;  %s1820_s18 = smov 8  }
  0x6d   : > { %s1821_s9 = smov 128   ;;  %293 = sbr.rel (%p1537_p11) target bundleno = 762 (0x2fa), region = 40 }
  0x6e   : > { %976 = dma.hbm_to_vmem [thread:$0]  (!%p1623_p9), %s280_s3, 256, %s282_s5, %s272_s8, %s1412_s21, %s1821_s9, %s1820_s18  }
  0x6f   : > { %s295_s19 = sand.u32 (!%p1537_p11), 1, %s1373_s25  }
  0x70   : > { %s861_s1 = sshll.u32 (!%p1537_p11), %s295_s19, 4  ;;  %s296_s16 = scalar_lea.sflag (!%p1537_p11), [#allocation5], %s295_s19 }
  0x71   : > { %s299_s24 = scalar_lea.vmem (!%p1537_p11), [#allocation4], %s861_s1 }
  0x72   : > { %1340 = dma.done.wait (%p1521_p3), %s296_s16, 256  }
  0x73   : > { %1342 = vsyncadd (%p1521_p3), %s296_s16, 4294967040  ;;  %p1822_p4 = scmp.ne.s32.totalorder %s1804_s10, 0 }
  0x75   : > { %1344 = dma.done.wait (%p1822_p4), [#allocation8], 4160  }
  0x76   : > { %1346 = vsyncadd (%p1822_p4), [#allocation8], 4294963136 }
  0x77   : > { %1348 = dma.done.wait (%p1822_p4), [#allocation11], 8320  }
  0x78   : > { %1350 = vsyncadd (%p1822_p4), [#allocation11], 4294958976  ;;  %s339_s3 = sand.u32 1, %s1361_s22   ;;  %p348_p11 = scmp.lt.s32.totalorder %s1385_s28, 2 }
  0x79   : > { %s866_s5 = sshll.u32 %s339_s3, 4  ;;  %p868_p3 = scmp.ne.s32.totalorder %s1381_s27, 0 }
  0x7a   : > { %s349_s12 = scalar_select %p348_p11, %s1385_s28, 2 }
  0x7b   : > { %s1658_s14 = scalar_lea.vmem [#allocation13], %s866_s5  ;;  %356 = sbr.rel (%p868_p3) target bundleno = 131 (0x83), region = 64 }
  0x7c   : > { %s867_s13 = sshll.u32 %s349_s12, 3 }
  0x7d   : > { %s1656_s2 = scalar_lea.vmem %s1784_s6, %s867_s13 }
  0x80   : > { %v357_v0 = vld [vmem:[%s299_s24] sm:$0xff]  ;;  %v358_v1 = vld [vmem:[%s299_s24 + $0x8] sm:$0xff]  ;;  %vm361_vm0 = vcmask 7168   ;;  %v1413_v2 = vmov 0.0  }
  0x81   : > { %359 = vst [vmem:[#allocation2] sm:$0xff] %v357_v0  ;;  %360 = vst [vmem:[#allocation2 + $0x8] sm:$0xff] %v358_v1 }
  0x82   : > { %362 = vst.msk [vmem:[#allocation3] sm:$0xff] %vm361_vm0, %v1413_v2 }
  0x83 PF: > { %s908_s10 = sshll.u32 %s1381_s27, 6  ;;  %p363_p6 = scmp.lt.s32.totalorder %s1381_s27, 0  ;;  %v1414_v3 = vmov 0.0   ;;  %vm1415_vm1 = vmmov 0   ;;  %v1416_v28 = vmov 0   ;;  %v517_v39 = vlaneseq }
  0x84   : > { %919 = vmatprep.subr.bf16.mxu0 %v1414_v3  ;;  %935 = vmatprep.mubr.msk.bf16.mxu0 %vm1415_vm1, %v1414_v3  ;;  %s364_s11 = ssub.s32 0, %s1381_s27  ;;  %s1664_s17 = scalar_lea.vmem [#allocation7], %s908_s10  ;;  %vm657_vm2 = vcmask 7168  }
  0x85   : > { %v1099_v4 = vld [vmem:[%s1664_s17 + $0x38] sm:$0xff]   ;;  %s869_s21 = smin.u32 %s1381_s27, %s364_s11  ;;  %s909_s9 = sshll.u32 %s1381_s27, 7  ;;  %v1100_v5 = vld [vmem:[%s1664_s17 + $0x30] sm:$0xff]   ;;  %v1101_v6 = vld [vmem:[%s1664_s17 + $0x28] sm:$0xff]   ;;  %639 = vmatprep.mubr.bf16.mxu1 %v1416_v28  ;;  %v518_v40 = vshrl.u32 %v517_v39, 7 }
  0x86   : > { %s366_s18 = sand.u32 1, %s869_s21   ;;  %920 = vmatpush3.bf16.msra.mxu0 %v1099_v4  ;;  %s1676_s24 = scalar_lea.vmem [#allocation10], %s909_s9  ;;  %v1102_v10 = vld [vmem:[%s1664_s17 + $0x20] sm:$0xff]   ;;  %v1103_v13 = vld [vmem:[%s1664_s17 + $0x18] sm:$0xff]   ;;  %v1104_v17 = vld [vmem:[%s1664_s17 + $0x10] sm:$0xff]  }
  0x87   : > { %s367_s19 = ssub.s32 0, %s366_s18  ;;  %921 = vmatprep.subr.bf16.mxu0 %v1414_v3  ;;  %v1107_v8 = vld [vmem:[%s1676_s24 + $0x74] ss:$8 sps:$4 sm:$0xff]   ;;  %v1109_v9 = vld [vmem:[%s1676_s24 + $0x70] ss:$8 sps:$4 sm:$0xff]   ;;  %v1105_v18 = vld [vmem:[%s1664_s17 + $0x8] sm:$0xff]  }
  0x88   : > { %s1847_s19 = smov (!%p363_p6, %s367_s19), %s366_s18  ;;  %v1110_v11 = vld [vmem:[%s1676_s24 + $0x64] ss:$8 sps:$4 sm:$0xff]   ;;  %607 = vmatprep.subr.bf16.mxu1 %v1107_v8  ;;  %v1112_v12 = vld [vmem:[%s1676_s24 + $0x60] ss:$8 sps:$4 sm:$0xff]   ;;  %v1113_v14 = vld [vmem:[%s1676_s24 + $0x54] ss:$8 sps:$4 sm:$0xff]  }
  0x89   : > { %s870_s1 = sshll.u32 %s1847_s19, 3  ;;  %608 = vmatpush1.bf16.msra.mxu1 %v1109_v9  ;;  %v1115_v15 = vld [vmem:[%s1676_s24 + $0x50] ss:$8 sps:$4 sm:$0xff]   ;;  %v1116_v16 = vld [vmem:[%s1676_s24 + $0x44] ss:$8 sps:$4 sm:$0xff]   ;;  %s396_s5 = scalar_lea.vmem [#allocation9], %s1381_s27 }
  0x8a   : > { %922 = vmatpush3.bf16.msra.mxu0 %v1100_v5  ;;  %s371_s16 = scalar_lea.vmem [#allocation2], %s870_s1  ;;  %609 = vmatprep.subr.bf16.mxu1 %v1110_v11  ;;  %v1106_v19 = vld [vmem:[%s1664_s17] sm:$0xff]   ;;  %v1119_v22 = vld [vmem:[%s1676_s24 + $0x34] ss:$8 sps:$4 sm:$0xff]   ;;  %v1121_v23 = vld [vmem:[%s1676_s24 + $0x30] ss:$8 sps:$4 sm:$0xff]  }
  0x8b   : > { %923 = vmatprep.subr.bf16.mxu0 %v1414_v3  ;;  %v372_v7 = vld [vmem:[%s371_s16] sm:$0xff]  ;;  %v1125_v26 = vld [vmem:[%s1676_s24 + $0x14] ss:$8 sps:$4 sm:$0xff]   ;;  %v1127_v27 = vld [vmem:[%s1676_s24 + $0x10] ss:$8 sps:$4 sm:$0xff]   ;;  %s885_s12 = sshll.u32 %s1381_s27, 1 }
  0x8c   : > { %902 = vst [vmem:[%s1658_s14 + $0x8] sm:$0xff] %v372_v7  ;;  %v376_v20 = vpack.c.bf16 %v372_v7, %v372_v7  ;;  %v1118_v21 = vld [vmem:[%s1676_s24 + $0x40] ss:$8 sps:$4 sm:$0xff]   ;;  %v1122_v24 = vld [vmem:[%s1676_s24 + $0x24] ss:$8 sps:$4 sm:$0xff]   ;;  %v519_v41 = vsub.s32 0, %v518_v40 }
  0x8d   : > { %610 = vmatpush1.bf16.msra.mxu1 %v1112_v12  ;;  %v1124_v25 = vld [vmem:[%s1676_s24 + $0x20] ss:$8 sps:$4 sm:$0xff]   ;;  %v1128_v29 = vld [vmem:[%s1676_s24 + $0x4] ss:$8 sps:$4 sm:$0xff]   ;;  %s514_s13 = scalar_lea.vmem [#allocation12], %s885_s12  ;;  %s369_s15 = ssub.s32 1, %s1847_s19 }
  0x8e   : > { %924 = vmatpush3.bf16.msra.mxu0 %v1101_v6  ;;  %611 = vmatprep.subr.bf16.mxu1 %v1113_v14  ;;  %v1130_v30 = vld [vmem:[%s1676_s24] ss:$8 sps:$4 sm:$0xff]   ;;  %s871_s8 = sshll.u32 %s369_s15, 3  ;;  %v523_v51 = vsub.s32 1, %v518_v40  ;;  %v653_v58 = vld [vmem:[#allocation3] sm:$0xff]  ;;  %p903_p5 = scmp.ne.s32.totalorder %s1381_s27, 3 }
  0x8f   : > { %925 = vmatprep.subr.bf16.mxu0 %v1414_v3  ;;  %v874_v31 = vld [vmem:[%s396_s5] ss:$0 sm:$0xff]  ;;  %s374_s10 = scalar_lea.vmem [#allocation2], %s871_s8 }
  0x90   : > { %v515_v42 = vld [vmem:[%s514_s13] sm:$0x3] }
  0x91   : > { %612 = vmatpush1.bf16.msra.mxu1 %v1115_v15  ;;  %v520_v43 = vrot.slane %v515_v42, %v519_v41  ;;  %v524_v52 = vrot.slane %v515_v42, %v523_v51  ;;  %v375_v53 = vld [vmem:[%s374_s10] sm:$0xff] }
  0x92   : > { %926 = vmatpush3.bf16.msra.mxu0 %v1102_v10  ;;  %613 = vmatprep.subr.bf16.mxu1 %v1116_v16 }
  0x93   : > { %927 = vmatprep.subr.bf16.mxu0 %v1414_v3 }
  0x95   : > { %614 = vmatpush1.bf16.msra.mxu1 %v1118_v21 }
  0x96   : > { %928 = vmatpush3.bf16.msra.mxu0 %v1103_v13  ;;  %615 = vmatprep.subr.bf16.mxu1 %v1119_v22 }
  0x97   : > { %929 = vmatprep.subr.bf16.mxu0 %v1414_v3 }
  0x99   : > { %616 = vmatpush1.bf16.msra.mxu1 %v1121_v23 }
  0x9a   : > { %930 = vmatpush3.bf16.msra.mxu0 %v1104_v17  ;;  %617 = vmatprep.subr.bf16.mxu1 %v1122_v24 }
  0x9b   : > { %931 = vmatprep.subr.bf16.mxu0 %v1414_v3 }
  0x9d   : > { %618 = vmatpush1.bf16.msra.mxu1 %v1124_v25 }
  0x9e   : > { %932 = vmatpush3.bf16.msra.mxu0 %v1105_v18  ;;  %619 = vmatprep.subr.bf16.mxu1 %v1125_v26 }
  0x9f   : > { %933 = vmatprep.subr.bf16.mxu0 %v1414_v3 }
  0xa1   : > { %620 = vmatpush1.bf16.msra.mxu1 %v1127_v27 }
  0xa2   : > { %934 = vmatpush3.bf16.msra.mxu0 %v1106_v19  ;;  %621 = vmatprep.subr.bf16.mxu1 %v1128_v29 }
  0xa5   : > { %936 = vmatmul.mubr.bf16.vlgmr.msra.gmra.mxu0 %v376_v20  ;;  %622 = vmatpush1.bf16.msra.mxu1 %v1130_v30 }
 0x165   : > { %v486_v32 = vpop.f32.mrf.mxu0 }
 0x166   : > { %v487_v33 = vadd.f32 %v874_v31, %v486_v32 }
 0x167   : > { %v937_v34 = vpop.f32.mrf.mxu0 }
 0x168   : > { %1131 = vtanh.f32 %v487_v33 }
 0x169   : > { %v489_v35 = vpop.f32.mrf.mxu0 }
 0x16b   : > { %v938_v36 = vpop.f32.mrf.mxu0 }
 0x175   : > { %v1132_v37 = vpop.eup %1131 }
 0x176   : > { %v493_v38 = vpack.c.bf16 %v1132_v37, %v1132_v37 }
 0x178   : > { %640 = vmatmul.mubr.bf16.vlgmr.msra.gmra.mxu1 %v493_v38 }
 0x238   : > { %v641_v44 = vpop.f32.mrf.mxu1 }
 0x239   : > { %v642_v45 = vadd.f32 %v641_v44, %v520_v43 }
 0x23a   : > { %v643_v46 = vpop.f32.mrf.mxu1 }
 0x23b   : > { %1133 = vtanh.f32 %v642_v45  ;;  %v644_v55 = vadd.f32 %v643_v46, %v524_v52 }
 0x23c   : > { %v645_v47 = vpop.f32.mrf.mxu1 }
 0x23e   : > { %v646_v48 = vpop.f32.mrf.mxu1 }
 0x248   : > { %v1134_v49 = vpop.eup %1133 }
 0x249   : > { %v649_v50 = vmul.f32 1.442695, %v1134_v49  ;;  %654 = vadd.xlane.f32.xlu0 %v1134_v49 }
 0x24b   : > { %1135 = vpow2.f32 %v649_v50 }
 0x258   : > { %v1136_v54 = vpop.eup %1135 }
 0x259   : > { %v651_v56 = vmul.f32 %v1136_v54, %v375_v53 }
 0x25b   : > { %v652_v57 = vadd.f32 %v651_v56, %v644_v55 }
 0x25d   : > { %659 = vst [vmem:[%s374_s10] sm:$0xff] %v652_v57  ;;  %660 = vst [vmem:[%s1658_s14] sm:$0xff] %v652_v57 }
 0x2d1   : > { %666 = sbr.rel (%p903_p5) target bundleno = 734 (0x2de), region = 68 }
 0x2d2   : > { %v655_v59 = vpop.xlane.xlu0 %654 }
 0x2d3   : > { %v656_v60 = vadd.f32 %v655_v59, %v653_v58 }
 0x2d5   : > { %658 = vst.msk [vmem:[#allocation3] sm:$0xff] %vm657_vm2, %v656_v60 }
 0x2dc   : > { %v667_v61 = vld [vmem:[#allocation3] sm:$0xff] }
 0x2dd   : > { %668 = vst.msk [vmem:[%s1656_s2] sm:$0xff] %vm657_vm2, %v667_v61 }
 0x2de PF: > { %s1823_s11 = sld [smem:[#allocation20_spill]]  ;;  %s939_s17 = smul.u32 6, %s1381_s27 }
 0x2df   : > { %s688_s21 = sshll.u32 %s1658_s14, 4  ;;  %s1824_s16 = sld [smem:[#allocation27_spill]]  ;;  %s1709_s21 = int_to_ptr.vmem [resolvable:$true] %s688_s21 }
 0x2e0   : > { %s685_s18 = sadd.s32 %s1385_s28, %s939_s17  ;;  %s1718_s2 = scalar_lea.sflag [#allocation6], %s339_s3 }
 0x2e1   : > { %s905_s9 = sshll.u32 %s685_s18, 7  ;;  %s1269_s5 = scalar_lea.vmem %s1709_s21, 256 }
 0x2e2   : > { %p1270_p9 = scmp.ne.s32.totalorder %s1709_s21, %s1269_s5  ;;  %s1417_s27 = smov [#allocation13]  }
 0x2e3   : > { %s1273_s28 = sshll.u32 %s1417_s27, 4  ;;  %s1274_s28 = int_to_ptr.vmem [resolvable:$false] %s1273_s28 }
 0x2e4   : > { %p1825_p1 = scmp.ne.s32.totalorder %s1823_s11, 0  ;;  %s1275_s14 = scalar_lea.vmem %s1274_s28, 512 }
 0x2e5   : > { %s1714_s24 = scalar_lea.hbm %s1824_s16, %s905_s9  ;;  %p1276_p0 = scmp.lt.s32.totalorder %s1709_s21, %s1274_s28 }
 0x2e6   : > { %p1271_p7 = pnand %p1270_p9, %p1825_p1  ;;  %p1277_p10 = scmp.lt.s32.totalorder %s1275_s14, %s1269_s5 }
 0x2e8   : > { %p1272_p8 = pneg %p1271_p7  ;;  %p1278_p12 = por %p1277_p10, %p1276_p0 }
 0x2ea   : > { %p1279_p13 = pnand %p1278_p12, %p1272_p8 }
 0x2ec   : > { %1282 = shalt.err (!%p1279_p13)
}
 0x2ed   : > { %s1283_s3 = scalar_lea.hbm %s1714_s24, 256  ;;  %s1287_s15 = scalar_lea.hbm %s1824_s16, 3072 }
 0x2ee   : > { %p1284_p2 = scmp.ne.s32.totalorder %s1714_s24, %s1283_s3  ;;  %p1288_p3 = scmp.lt.s32.totalorder %s1714_s24, %s1824_s16 }
 0x2ef   : > { %p1289_p6 = scmp.lt.s32.totalorder %s1287_s15, %s1283_s3 }
 0x2f0   : > { %p1285_p4 = pnand %p1284_p2, %p1825_p1 }
 0x2f1   : > { %p1290_p5 = por %p1289_p6, %p1288_p3 }
 0x2f2   : > { %p1286_p11 = pneg %p1285_p4 }
 0x2f4   : > { %p1291_p9 = pnand %p1290_p5, %p1286_p11 }
 0x2f6   : > { %1294 = shalt.err (!%p1291_p9)
}
 0x2f7   : > { %s1418_s17 = smov 128   ;;  %s1419_s18 = smov 384  }
 0x2f8   : > { %s1420_s9 = smov 8  }
 0x2f9   : > { %958 = dma.vmem_to_hbm [thread:$0]  (%p1825_p1), %s1709_s21, 256, %s1714_s24, %s1718_s2, %s1418_s17, %s1419_s18, %s1420_s9  }
 0x2fa PF: > { %s1826_s19 = sld [smem:[#allocation18_spill]]  ;;  %p990_p7 = scmp.ge.s32.totalorder %s1397_s7, 2 }
 0x2fb   : > { %s1827_s1 = sld [smem:[#allocation21_spill]] }
 0x300   : > { %s706_s5 = sand.u32 1, %s1826_s19  }
 0x301   : > { %p1828_p8 = scmp.ne.s32.totalorder %s1827_s1, 0  ;;  %s707_s27 = scalar_lea.sflag [#allocation6], %s706_s5 }
 0x303   : > { %p978_p0 = pnand %p990_p7, %p1828_p8 }
 0x305   : > { %p979_p10 = pneg %p978_p0 }
 0x307   : > { %1352 = dma.done.wait (%p979_p10), %s707_s27, 256  }
 0x308   : > { %1354 = vsyncadd (%p979_p10), %s707_s27, 4294967040  ;;  %s25_s7 = sadd.s32 1, %s1397_s7   ;;  %s1829_s27 = sld [smem:[#allocation19_spill]] }
 0x309   : > { %p22_p12 = scmp.ge.s32.totalorder %s25_s7, 14   ;;  %s1830_s11 = sld [smem:[#allocation22_spill]] }
 0x30a   : > { %s1831_s21 = smov %s1361_s22  ;;  %s1832_s22 = smov %s1365_s23 }
 0x30b   : > { %s1833_s23 = smov %s1617_s29  ;;  %s1834_s24 = smov %s1373_s25 }
 0x30c   : > { %s1835_s25 = smov %s1377_s26  ;;  %s1836_s26 = smov %s1612_s4 }
 0x30d   : > { %s1837_s28 = smov %s1393_s30  ;;  %s1839_s30 = smov %s1845_s20 }
 0x30e   :  { %24 = sbr.rel (!%p22_p12) target bundleno = 17 (0x11), region = 128 }
 0x30f   : > { %s1838_s29 = smov %s1830_s11 }
 0x313   :  { %719 = vsyncpa [#allocation5], 1 }
 0x314   :  { %721 = vsyncpa [#allocation5 + $0x1], 1 }
 0x315   :  { %722 = vsyncpa [#allocation8], 1 }
 0x316   :  { %723 = vsyncpa [#allocation11], 1 }
 0x317   :  { %724 = vsyncpa [#allocation6], 1 }
 0x318   :  { %726 = vsyncpa [#allocation6 + $0x1], 1 }

// kernel: tpu_custom_call.1
= control target key start
LH: loop header
LB: loop body
LE: loop exit
PB: predicated region body
PF: predicated region fallthrough
CT: control target
= control target key end

     0   :  { %s1778_s0 = inlined_call_operand.hbm [shape: f32[2,24,128], index: 0, kind: input, shape index: {}]   ;;  %s1779_s1 = inlined_call_operand.hbm [shape: bf16[4,128,128], index: 1, kind: input, shape index: {}]   ;;  %s1780_s2 = inlined_call_operand.hbm [shape: f32[4,1,128], index: 2, kind: input, shape index: {}]   ;;  %s1781_s3 = inlined_call_operand.hbm [shape: bf16[4,128,256], index: 3, kind: input, shape index: {}]   ;;  %s1782_s4 = inlined_call_operand.hbm [shape: f32[4,1,256], index: 4, kind: input, shape index: {}]   ;;  %s1783_s5 = inlined_call_operand.hbm [shape: f32[4,2,24,128], index: 5, kind: output, shape index: {0}]   ;;  %s1784_s6 = inlined_call_operand.vmem [shape: f32[24,1], index: 6, kind: output, shape index: {1}]  }
   0x1   :  { %1797 = sst [smem:[#allocation23_spill]] %s1779_s1 }
   0x2   :  { %1798 = sst [smem:[#allocation24_spill]] %s1780_s2 }
   0x3   :  { %1799 = sst [smem:[#allocation25_spill]] %s1781_s3 }
   0x4   :  { %1800 = sst [smem:[#allocation26_spill]] %s1782_s4 }
   0x5   :  { %1801 = sst [smem:[#allocation27_spill]] %s1783_s5 }
   0x6   :  { %12 = vsyncpa [#allocation5], 0 }
   0x7   :  { %14 = vsyncpa [#allocation5 + $0x1], 0 }
   0x8   :  { %15 = vsyncpa [#allocation8], 0 }
   0x9   :  { %16 = vsyncpa [#allocation11], 0 }
   0xa   :  { %17 = vsyncpa [#allocation6], 0 }
   0xb   :  { %19 = vsyncpa [#allocation6 + $0x1], 0  ;;  %s1456_s21 = smov 0   ;;  %s1458_s22 = smov 0  }
   0xc   :  { %s1460_s23 = smov 0   ;;  %s1462_s24 = smov 0  }
   0xd   :  { %s1464_s25 = smov 0   ;;  %s1466_s26 = smov 0  }
   0xe   :  { %s1468_s27 = smov 0   ;;  %s1470_s28 = smov 0  }
   0xf   :  { %s1472_s29 = smov 0   ;;  %s1474_s30 = smov 0  }
  0x10   :  { %s1476_s7 = smov 0  }
  0x11 LB: > { %1802 = sst [smem:[#allocation18_spill]] %s1357_s21  ;;  %s850_s8 = sadd.s32 4294967295, %s1397_s7   ;;  %s1397_s7 = sphi %s1476_s7, %s25_s7   ;;  %s1393_s30 = sphi %s1474_s30, %s1839_s30   ;;  %s1389_s29 = sphi %s1472_s29, %s1838_s29   ;;  %s1385_s28 = sphi %s1470_s28, %s1837_s28   ;;  %s1381_s27 = sphi %s1468_s27, %s1829_s27   ;;  %s1377_s26 = sphi %s1466_s26, %s1836_s26   ;;  %s1373_s25 = sphi %s1464_s25, %s1835_s25   ;;  %s1369_s24 = sphi %s1462_s24, %s1834_s24   ;;  %s1365_s23 = sphi %s1460_s23, %s1833_s23   ;;  %s1361_s22 = sphi %s1458_s22, %s1832_s22   ;;  %s1357_s21 = sphi %s1456_s21, %s1831_s21  }
  0x12   : > { %1803 = sst [smem:[#allocation19_spill]] %s1389_s29  ;;  %s851_s9 = sadd.s32 4294967294, %s1397_s7  }
  0x13   : > { %p57_p0 = scmp.ne.s32.totalorder %s1373_s25, %s1369_s24  ;;  %p1512_p1 = scmp.eq.s32.totalorder %s850_s8, 0 }
  0x14   : > { %p166_p2 = scmp.ne.s32.totalorder %s1365_s23, %s1361_s22  ;;  %p167_p4 = scmp.eq.s32.totalorder %s850_s8, 11 }
  0x15   : > { %s1804_s10 = scalar_select %p1512_p1, 1, 0 }
  0x16   : > { %p1521_p3 = por %p1512_p1, %p57_p0  ;;  %p172_p5 = scmp.ne.s32.totalorder %s1361_s22, %s1357_s21 }
  0x17   : > { %p173_p6 = scmp.eq.s32.totalorder %s851_s9, 11  ;;  %p1527_p7 = por %p167_p4, %p166_p2 }
  0x18   : > { %p852_p8 = scmp.ge.s32.totalorder %s1397_s7, 1  ;;  %p206_p10 = scmp.lt.s32.totalorder %s1397_s7, 13 }
  0x19   : > { %s1806_s13 = scalar_select %p1527_p7, 1, 0 }
  0x1a   : > { %p1532_p9 = por %p173_p6, %p172_p5  ;;  %p1537_p11 = pnand %p852_p8, %p206_p10 }
  0x1b   : > { %1807 = sst [smem:[#allocation20_spill]] %s1806_s13  ;;  %s1399_s16 = smov [#allocation7]  }
  0x1c   : > { %s1808_s14 = scalar_select %p1532_p9, 1, 0 }
  0x1d   : > { %s218_s17 = sshll.u32 %s1399_s16, 4  ;;  %p960_p12 = pneg %p1537_p11  ;;  %s219_s17 = int_to_ptr.vmem [resolvable:$true] %s218_s17 }
  0x1e   : > { %1809 = sst [smem:[#allocation21_spill]] %s1808_s14  ;;  %s1400_s19 = smov [#allocation10]  }
  0x1f   : > { %p1545_p13 = pnand %p960_p12, %p1512_p1  ;;  %s244_s20 = sshll.u32 %s1400_s19, 4  ;;  %s245_s20 = int_to_ptr.vmem [resolvable:$true] %s244_s20 }
  0x20   : > { %s1148_s24 = scalar_lea.vmem %s219_s17, 4096  ;;  %p1156_p6 = scmp.lt.s32.totalorder %s219_s17, %s219_s17 }
  0x21   : > { %p1139_p0 = pneg %p1545_p13  ;;  %p1149_p2 = scmp.ne.s32.totalorder %s219_s17, %s1148_s24 }
  0x22   : > { %p1157_p8 = scmp.lt.s32.totalorder %s1148_s24, %s1148_s24 }
  0x23   : > { %p1151_p4 = pnand %p1149_p2, %p1139_p0 }
  0x24   : > { %p1158_p10 = por %p1157_p8, %p1156_p6 }
  0x25   : > { %p1152_p5 = pneg %p1151_p4 }
  0x27   : > { %p1159_p12 = pnand %p1158_p10, %p1152_p5 }
  0x29   : > { %1162 = shalt.err (!%p1159_p12)
}
  0x2a   : > { %s1401_s8 = smov 64   ;;  %s1402_s9 = smov 4  }
  0x2b   : > { %s1812_s1 = sld [smem:[#allocation23_spill]]  ;;  %s1174_s11 = scalar_lea.vmem %s245_s20, 8192 }
  0x2c   : > { %p1175_p9 = scmp.ne.s32.totalorder %s245_s20, %s1174_s11  ;;  %p1182_p7 = scmp.lt.s32.totalorder %s245_s20, %s245_s20 }
  0x2d   : > { %p1183_p1 = scmp.lt.s32.totalorder %s1174_s11, %s1174_s11 }
  0x2e   : > { %p1177_p2 = pnand %p1175_p9, %p1139_p0 }
  0x2f   : > { %p1184_p6 = por %p1183_p1, %p1182_p7 }
  0x30   : > { %p1178_p4 = pneg %p1177_p2 }
  0x31   : > { %963 = dma.hbm_to_vmem [thread:$0]  (!%p1545_p13), %s1812_s1, 4096, %s219_s17, [#allocation8], %s1401_s8, %s1401_s8, %s1402_s9  }
  0x32   : > { %p1185_p5 = pnand %p1184_p6, %p1178_p4 }
  0x34   : > { %1188 = shalt.err (!%p1185_p5)
}
  0x35   : > { %s1789_s24 = smov 128   ;;  %s1790_s14 = smov 8  }
  0x36   : > { %s1813_s3 = sld [smem:[#allocation25_spill]]  ;;  %s1405_s9 = smov [#allocation9]  }
  0x37   : > { %s231_s16 = sshll.u32 %s1405_s9, 4  ;;  %s232_s16 = int_to_ptr.vmem [resolvable:$true] %s231_s16 }
  0x38   : > { %s1200_s19 = scalar_lea.vmem %s232_s16, 64  ;;  %p1208_p8 = scmp.lt.s32.totalorder %s232_s16, %s232_s16 }
  0x39   : > { %p1201_p9 = scmp.ne.s32.totalorder %s232_s16, %s1200_s19  ;;  %p1209_p10 = scmp.lt.s32.totalorder %s1200_s19, %s1200_s19 }
  0x3b   : > { %p1203_p1 = pnand %p1201_p9, %p1139_p0  ;;  %p1210_p12 = por %p1209_p10, %p1208_p8 }
  0x3c   : > { %969 = dma.hbm_to_vmem [thread:$0]  (!%p1545_p13), %s1813_s3, 8192, %s245_s20, [#allocation11], %s1789_s24, %s1789_s24, %s1790_s14  }
  0x3d   : > { %p1204_p7 = pneg %p1203_p1 }
  0x3f   : > { %p1211_p2 = pnand %p1210_p12, %p1204_p7 }
  0x41   : > { %1214 = shalt.err (!%p1211_p2)
}
  0x42   : > { %s1406_s11 = smov 16   ;;  %s1407_s1 = smov 1  }
  0x43   : > { %s1814_s2 = sld [smem:[#allocation24_spill]]  ;;  %s1408_s8 = smov [#allocation12]  }
  0x44   : > { %s257_s9 = sshll.u32 %s1408_s8, 4  ;;  %s258_s9 = int_to_ptr.vmem [resolvable:$true] %s257_s9 }
  0x45   : > { %s1226_s24 = scalar_lea.vmem %s258_s9, 128  ;;  %p1234_p9 = scmp.lt.s32.totalorder %s258_s9, %s258_s9 }
  0x46   : > { %p1227_p4 = scmp.ne.s32.totalorder %s258_s9, %s1226_s24  ;;  %p1235_p1 = scmp.lt.s32.totalorder %s1226_s24, %s1226_s24 }
  0x48   : > { %p1229_p6 = pnand %p1227_p4, %p1139_p0  ;;  %p1236_p7 = por %p1235_p1, %p1234_p9 }
  0x49   : > { %966 = dma.hbm_to_vmem [thread:$0]  (!%p1545_p13), %s1814_s2, 64, %s232_s16, [#allocation8], %s1406_s11, %s1406_s11, %s1407_s1  }
  0x4a   : > { %p1230_p5 = pneg %p1229_p6 }
  0x4c   : > { %p1237_p8 = pnand %p1236_p7, %p1230_p5 }
  0x4e   : > { %1240 = shalt.err (!%p1237_p8)
}
  0x4f   : > { %s1409_s19 = smov 32   ;;  %s1410_s1 = smov 2  }
  0x50   : > { %s1815_s4 = sld [smem:[#allocation26_spill]]  ;;  %s34_s11 = sadd.s32 1, %s1389_s29 }
  0x51   : > { %s37_s20 = sadd.s32 1, %s1393_s30  ;;  %p35_p0 = scmp.ge.s32.totalorder %s34_s11, 4 }
  0x52   : > { %s44_s17 = sadd.s32 1, %s1377_s26  ;;  %p51_p10 = scmp.ne.s32.totalorder %s1377_s26, %s1373_s25 }
  0x53   : > { %p52_p12 = scmp.eq.s32.totalorder %s1397_s7, 0  ;;  %s1841_s11 = smov (%p35_p0, %s34_s11), 0 }
  0x54   : > { %1816 = sst [smem:[#allocation22_spill]] %s1841_s11  ;;  %s1843_s20 = smov (!%p35_p0, %s37_s20), %s1393_s30 }
  0x55   : > { %p1595_p2 = por %p52_p12, %p51_p10  ;;  %s151_s8 = ssub.s32 %s1389_s29, %s1841_s11 }
  0x56   : > { %972 = dma.hbm_to_vmem [thread:$0]  (!%p1545_p13), %s1815_s4, 128, %s258_s9, [#allocation11], %s1409_s19, %s1409_s19, %s1410_s1  }
  0x57   : > { %p39_p13 = scmp.ge.s32.totalorder %s1843_s20, 3  ;;  %p985_p4 = scmp.lt.s32.totalorder %s1397_s7, 12 }
  0x58   : > { %s271_s9 = sand.u32 1, %s1377_s26   ;;  %s859_s19 = sshll.u32 %s1393_s30, 7 }
  0x59   : > { %s1845_s20 = smov (%p39_p13, %s1843_s20), 0  ;;  %s858_s1 = sshll.u32 %s271_s9, 4 }
  0x5a   : > { %s41_s16 = ssub.s32 %s1393_s30, %s1845_s20  ;;  %s280_s3 = scalar_lea.hbm %s1778_s0, %s859_s19 }
  0x5b   : > { %p42_p6 = scmp.eq.s32.totalorder %s41_s16, 0  ;;  %s153_s24 = sor.u32 %s151_s8, %s41_s16 }
  0x5c   : > { %p154_p5 = scmp.eq.s32.totalorder %s153_s24, 0  ;;  %s1818_s11 = sadd.s32 1, %s1365_s23 }
  0x5d   : > { %s1612_s4 = scalar_select %p42_p6, %s1377_s26, %s44_s17  }
  0x5e   : > { %s1617_s29 = scalar_select %p154_p5, %s1365_s23, %s1818_s11  }
  0x5f   : > { %s275_s21 = scalar_lea.vmem [#allocation4], %s858_s1  ;;  %p1623_p9 = pnand %p985_p4, %p1595_p2 }
  0x60   : > { %s281_s5 = sshll.u32 %s275_s21, 4  ;;  %s272_s8 = scalar_lea.sflag [#allocation5], %s271_s9  ;;  %s282_s5 = int_to_ptr.vmem [resolvable:$true] %s281_s5 }
  0x61   : > { %p1243_p1 = pneg %p1623_p9  ;;  %s1254_s2 = scalar_lea.vmem %s282_s5, 256 }
  0x62   : > { %p1255_p7 = scmp.ne.s32.totalorder %s282_s5, %s1254_s2  ;;  %s1411_s14 = smov [#allocation4]  }
  0x63   : > { %s1259_s11 = sshll.u32 %s1411_s14, 4  ;;  %s1260_s11 = int_to_ptr.vmem [resolvable:$false] %s1259_s11 }
  0x64   : > { %p1257_p8 = pnand %p1255_p7, %p1243_p1  ;;  %s1261_s17 = scalar_lea.vmem %s1260_s11, 512 }
  0x65   : > { %p1262_p10 = scmp.lt.s32.totalorder %s282_s5, %s1260_s11  ;;  %p1263_p12 = scmp.lt.s32.totalorder %s1261_s17, %s1254_s2 }
  0x66   : > { %p1258_p0 = pneg %p1257_p8 }
  0x67   : > { %p1264_p13 = por %p1263_p12, %p1262_p10 }
  0x69   : > { %p1265_p2 = pnand %p1264_p13, %p1258_p0 }
  0x6b   : > { %1268 = shalt.err (!%p1265_p2)
}
  0x6c   : > { %s1412_s21 = smov 384   ;;  %s1820_s18 = smov 8  }
  0x6d   : > { %s1821_s9 = smov 128   ;;  %293 = sbr.rel (%p1537_p11) target bundleno = 762 (0x2fa), region = 40 }
  0x6e   : > { %976 = dma.hbm_to_vmem [thread:$0]  (!%p1623_p9), %s280_s3, 256, %s282_s5, %s272_s8, %s1412_s21, %s1821_s9, %s1820_s18  }
  0x6f   : > { %s295_s19 = sand.u32 (!%p1537_p11), 1, %s1373_s25  }
  0x70   : > { %s861_s1 = sshll.u32 (!%p1537_p11), %s295_s19, 4  ;;  %s296_s16 = scalar_lea.sflag (!%p1537_p11), [#allocation5], %s295_s19 }
  0x71   : > { %s299_s24 = scalar_lea.vmem (!%p1537_p11), [#allocation4], %s861_s1 }
  0x72   : > { %1340 = dma.done.wait (%p1521_p3), %s296_s16, 256  }
  0x73   : > { %1342 = vsyncadd (%p1521_p3), %s296_s16, 4294967040  ;;  %p1822_p4 = scmp.ne.s32.totalorder %s1804_s10, 0 }
  0x75   : > { %1344 = dma.done.wait (%p1822_p4), [#allocation8], 4160  }
  0x76   : > { %1346 = vsyncadd (%p1822_p4), [#allocation8], 4294963136 }
  0x77   : > { %1348 = dma.done.wait (%p1822_p4), [#allocation11], 8320  }
  0x78   : > { %1350 = vsyncadd (%p1822_p4), [#allocation11], 4294958976  ;;  %s339_s3 = sand.u32 1, %s1361_s22   ;;  %p348_p11 = scmp.lt.s32.totalorder %s1385_s28, 2 }
  0x79   : > { %s866_s5 = sshll.u32 %s339_s3, 4  ;;  %p868_p3 = scmp.ne.s32.totalorder %s1381_s27, 0 }
  0x7a   : > { %s349_s12 = scalar_select %p348_p11, %s1385_s28, 2 }
  0x7b   : > { %s1658_s14 = scalar_lea.vmem [#allocation13], %s866_s5  ;;  %356 = sbr.rel (%p868_p3) target bundleno = 131 (0x83), region = 64 }
  0x7c   : > { %s867_s13 = sshll.u32 %s349_s12, 3 }
  0x7d   : > { %s1656_s2 = scalar_lea.vmem %s1784_s6, %s867_s13 }
  0x80   : > { %v357_v0 = vld [vmem:[%s299_s24] sm:$0xff]  ;;  %v358_v1 = vld [vmem:[%s299_s24 + $0x8] sm:$0xff]  ;;  %vm361_vm0 = vcmask 7168   ;;  %v1413_v2 = vmov 0.0  }
  0x81   : > { %359 = vst [vmem:[#allocation2] sm:$0xff] %v357_v0  ;;  %360 = vst [vmem:[#allocation2 + $0x8] sm:$0xff] %v358_v1 }
  0x82   : > { %362 = vst.msk [vmem:[#allocation3] sm:$0xff] %vm361_vm0, %v1413_v2 }
  0x83 PF: > { %s908_s10 = sshll.u32 %s1381_s27, 6  ;;  %p363_p6 = scmp.lt.s32.totalorder %s1381_s27, 0  ;;  %v1414_v3 = vmov 0.0   ;;  %vm1415_vm1 = vmmov 0   ;;  %v1416_v28 = vmov 0   ;;  %v517_v39 = vlaneseq }
  0x84   : > { %919 = vmatprep.subr.bf16.mxu0 %v1414_v3  ;;  %935 = vmatprep.mubr.msk.bf16.mxu0 %vm1415_vm1, %v1414_v3  ;;  %s364_s11 = ssub.s32 0, %s1381_s27  ;;  %s1664_s17 = scalar_lea.vmem [#allocation7], %s908_s10  ;;  %vm657_vm2 = vcmask 7168  }
  0x85   : > { %v1099_v4 = vld [vmem:[%s1664_s17 + $0x38] sm:$0xff]   ;;  %s869_s21 = smin.u32 %s1381_s27, %s364_s11  ;;  %s909_s9 = sshll.u32 %s1381_s27, 7  ;;  %v1100_v5 = vld [vmem:[%s1664_s17 + $0x30] sm:$0xff]   ;;  %v1101_v6 = vld [vmem:[%s1664_s17 + $0x28] sm:$0xff]   ;;  %639 = vmatprep.mubr.bf16.mxu1 %v1416_v28  ;;  %v518_v40 = vshrl.u32 %v517_v39, 7 }
  0x86   : > { %s366_s18 = sand.u32 1, %s869_s21   ;;  %920 = vmatpush3.bf16.msra.mxu0 %v1099_v4  ;;  %s1676_s24 = scalar_lea.vmem [#allocation10], %s909_s9  ;;  %v1102_v10 = vld [vmem:[%s1664_s17 + $0x20] sm:$0xff]   ;;  %v1103_v13 = vld [vmem:[%s1664_s17 + $0x18] sm:$0xff]   ;;  %v1104_v17 = vld [vmem:[%s1664_s17 + $0x10] sm:$0xff]  }
  0x87   : > { %s367_s19 = ssub.s32 0, %s366_s18  ;;  %921 = vmatprep.subr.bf16.mxu0 %v1414_v3  ;;  %v1107_v8 = vld [vmem:[%s1676_s24 + $0x74] ss:$8 sps:$4 sm:$0xff]   ;;  %v1109_v9 = vld [vmem:[%s1676_s24 + $0x70] ss:$8 sps:$4 sm:$0xff]   ;;  %v1105_v18 = vld [vmem:[%s1664_s17 + $0x8] sm:$0xff]  }
  0x88   : > { %s1847_s19 = smov (!%p363_p6, %s367_s19), %s366_s18  ;;  %v1110_v11 = vld [vmem:[%s1676_s24 + $0x64] ss:$8 sps:$4 sm:$0xff]   ;;  %607 = vmatprep.subr.bf16.mxu1 %v1107_v8  ;;  %v1112_v12 = vld [vmem:[%s1676_s24 + $0x60] ss:$8 sps:$4 sm:$0xff]   ;;  %v1113_v14 = vld [vmem:[%s1676_s24 + $0x54] ss:$8 sps:$4 sm:$0xff]  }
  0x89   : > { %s870_s1 = sshll.u32 %s1847_s19, 3  ;;  %608 = vmatpush1.bf16.msra.mxu1 %v1109_v9  ;;  %v1115_v15 = vld [vmem:[%s1676_s24 + $0x50] ss:$8 sps:$4 sm:$0xff]   ;;  %v1116_v16 = vld [vmem:[%s1676_s24 + $0x44] ss:$8 sps:$4 sm:$0xff]   ;;  %s396_s5 = scalar_lea.vmem [#allocation9], %s1381_s27 }
  0x8a   : > { %922 = vmatpush3.bf16.msra.mxu0 %v1100_v5  ;;  %s371_s16 = scalar_lea.vmem [#allocation2], %s870_s1  ;;  %609 = vmatprep.subr.bf16.mxu1 %v1110_v11  ;;  %v1106_v19 = vld [vmem:[%s1664_s17] sm:$0xff]   ;;  %v1119_v22 = vld [vmem:[%s1676_s24 + $0x34] ss:$8 sps:$4 sm:$0xff]   ;;  %v1121_v23 = vld [vmem:[%s1676_s24 + $0x30] ss:$8 sps:$4 sm:$0xff]  }
  0x8b   : > { %923 = vmatprep.subr.bf16.mxu0 %v1414_v3  ;;  %v372_v7 = vld [vmem:[%s371_s16] sm:$0xff]  ;;  %v1125_v26 = vld [vmem:[%s1676_s24 + $0x14] ss:$8 sps:$4 sm:$0xff]   ;;  %v1127_v27 = vld [vmem:[%s1676_s24 + $0x10] ss:$8 sps:$4 sm:$0xff]   ;;  %s885_s12 = sshll.u32 %s1381_s27, 1 }
  0x8c   : > { %902 = vst [vmem:[%s1658_s14 + $0x8] sm:$0xff] %v372_v7  ;;  %v376_v20 = vpack.c.bf16 %v372_v7, %v372_v7  ;;  %v1118_v21 = vld [vmem:[%s1676_s24 + $0x40] ss:$8 sps:$4 sm:$0xff]   ;;  %v1122_v24 = vld [vmem:[%s1676_s24 + $0x24] ss:$8 sps:$4 sm:$0xff]   ;;  %v519_v41 = vsub.s32 0, %v518_v40 }
  0x8d   : > { %610 = vmatpush1.bf16.msra.mxu1 %v1112_v12  ;;  %v1124_v25 = vld [vmem:[%s1676_s24 + $0x20] ss:$8 sps:$4 sm:$0xff]   ;;  %v1128_v29 = vld [vmem:[%s1676_s24 + $0x4] ss:$8 sps:$4 sm:$0xff]   ;;  %s514_s13 = scalar_lea.vmem [#allocation12], %s885_s12  ;;  %s369_s15 = ssub.s32 1, %s1847_s19 }
  0x8e   : > { %924 = vmatpush3.bf16.msra.mxu0 %v1101_v6  ;;  %611 = vmatprep.subr.bf16.mxu1 %v1113_v14  ;;  %v1130_v30 = vld [vmem:[%s1676_s24] ss:$8 sps:$4 sm:$0xff]   ;;  %s871_s8 = sshll.u32 %s369_s15, 3  ;;  %v523_v51 = vsub.s32 1, %v518_v40  ;;  %v653_v58 = vld [vmem:[#allocation3] sm:$0xff]  ;;  %p903_p5 = scmp.ne.s32.totalorder %s1381_s27, 3 }
  0x8f   : > { %925 = vmatprep.subr.bf16.mxu0 %v1414_v3  ;;  %v874_v31 = vld [vmem:[%s396_s5] ss:$0 sm:$0xff]  ;;  %s374_s10 = scalar_lea.vmem [#allocation2], %s871_s8 }
  0x90   : > { %v515_v42 = vld [vmem:[%s514_s13] sm:$0x3] }
  0x91   : > { %612 = vmatpush1.bf16.msra.mxu1 %v1115_v15  ;;  %v520_v43 = vrot.slane %v515_v42, %v519_v41  ;;  %v524_v52 = vrot.slane %v515_v42, %v523_v51  ;;  %v375_v53 = vld [vmem:[%s374_s10] sm:$0xff] }
  0x92   : > { %926 = vmatpush3.bf16.msra.mxu0 %v1102_v10  ;;  %613 = vmatprep.subr.bf16.mxu1 %v1116_v16 }
  0x93   : > { %927 = vmatprep.subr.bf16.mxu0 %v1414_v3 }
  0x95   : > { %614 = vmatpush1.bf16.msra.mxu1 %v1118_v21 }
  0x96   : > { %928 = vmatpush3.bf16.msra.mxu0 %v1103_v13  ;;  %615 = vmatprep.subr.bf16.mxu1 %v1119_v22 }
  0x97   : > { %929 = vmatprep.subr.bf16.mxu0 %v1414_v3 }
  0x99   : > { %616 = vmatpush1.bf16.msra.mxu1 %v1121_v23 }
  0x9a   : > { %930 = vmatpush3.bf16.msra.mxu0 %v1104_v17  ;;  %617 = vmatprep.subr.bf16.mxu1 %v1122_v24 }
  0x9b   : > { %931 = vmatprep.subr.bf16.mxu0 %v1414_v3 }
  0x9d   : > { %618 = vmatpush1.bf16.msra.mxu1 %v1124_v25 }
  0x9e   : > { %932 = vmatpush3.bf16.msra.mxu0 %v1105_v18  ;;  %619 = vmatprep.subr.bf16.mxu1 %v1125_v26 }
  0x9f   : > { %933 = vmatprep.subr.bf16.mxu0 %v1414_v3 }
  0xa1   : > { %620 = vmatpush1.bf16.msra.mxu1 %v1127_v27 }
  0xa2   : > { %934 = vmatpush3.bf16.msra.mxu0 %v1106_v19  ;;  %621 = vmatprep.subr.bf16.mxu1 %v1128_v29 }
  0xa5   : > { %936 = vmatmul.mubr.bf16.vlgmr.msra.gmra.mxu0 %v376_v20  ;;  %622 = vmatpush1.bf16.msra.mxu1 %v1130_v30 }
 0x165   : > { %v486_v32 = vpop.f32.mrf.mxu0 }
 0x166   : > { %v487_v33 = vadd.f32 %v874_v31, %v486_v32 }
 0x167   : > { %v937_v34 = vpop.f32.mrf.mxu0 }
 0x168   : > { %1131 = vtanh.f32 %v487_v33 }
 0x169   : > { %v489_v35 = vpop.f32.mrf.mxu0 }
 0x16b   : > { %v938_v36 = vpop.f32.mrf.mxu0 }
 0x175   : > { %v1132_v37 = vpop.eup %1131 }
 0x176   : > { %v493_v38 = vpack.c.bf16 %v1132_v37, %v1132_v37 }
 0x178   : > { %640 = vmatmul.mubr.bf16.vlgmr.msra.gmra.mxu1 %v493_v38 }
 0x238   : > { %v641_v44 = vpop.f32.mrf.mxu1 }
 0x239   : > { %v642_v45 = vadd.f32 %v641_v44, %v520_v43 }
 0x23a   : > { %v643_v46 = vpop.f32.mrf.mxu1 }
 0x23b   : > { %1133 = vtanh.f32 %v642_v45  ;;  %v644_v55 = vadd.f32 %v643_v46, %v524_v52 }
 0x23c   : > { %v645_v47 = vpop.f32.mrf.mxu1 }
 0x23e   : > { %v646_v48 = vpop.f32.mrf.mxu1 }
 0x248   : > { %v1134_v49 = vpop.eup %1133 }
 0x249   : > { %v649_v50 = vmul.f32 1.442695, %v1134_v49  ;;  %654 = vadd.xlane.f32.xlu0 %v1134_v49 }
 0x24b   : > { %1135 = vpow2.f32 %v649_v50 }
 0x258   : > { %v1136_v54 = vpop.eup %1135 }
 0x259   : > { %v651_v56 = vmul.f32 %v1136_v54, %v375_v53 }
 0x25b   : > { %v652_v57 = vadd.f32 %v651_v56, %v644_v55 }
 0x25d   : > { %659 = vst [vmem:[%s374_s10] sm:$0xff] %v652_v57  ;;  %660 = vst [vmem:[%s1658_s14] sm:$0xff] %v652_v57 }
 0x2d1   : > { %666 = sbr.rel (%p903_p5) target bundleno = 734 (0x2de), region = 68 }
 0x2d2   : > { %v655_v59 = vpop.xlane.xlu0 %654 }
 0x2d3   : > { %v656_v60 = vadd.f32 %v655_v59, %v653_v58 }
 0x2d5   : > { %658 = vst.msk [vmem:[#allocation3] sm:$0xff] %vm657_vm2, %v656_v60 }
 0x2dc   : > { %v667_v61 = vld [vmem:[#allocation3] sm:$0xff] }
 0x2dd   : > { %668 = vst.msk [vmem:[%s1656_s2] sm:$0xff] %vm657_vm2, %v667_v61 }
 0x2de PF: > { %s1823_s11 = sld [smem:[#allocation20_spill]]  ;;  %s939_s17 = smul.u32 6, %s1381_s27 }
 0x2df   : > { %s688_s21 = sshll.u32 %s1658_s14, 4  ;;  %s1824_s16 = sld [smem:[#allocation27_spill]]  ;;  %s1709_s21 = int_to_ptr.vmem [resolvable:$true] %s688_s21 }
 0x2e0   : > { %s685_s18 = sadd.s32 %s1385_s28, %s939_s17  ;;  %s1718_s2 = scalar_lea.sflag [#allocation6], %s339_s3 }
 0x2e1   : > { %s905_s9 = sshll.u32 %s685_s18, 7  ;;  %s1269_s5 = scalar_lea.vmem %s1709_s21, 256 }
 0x2e2   : > { %p1270_p9 = scmp.ne.s32.totalorder %s1709_s21, %s1269_s5  ;;  %s1417_s27 = smov [#allocation13]  }
 0x2e3   : > { %s1273_s28 = sshll.u32 %s1417_s27, 4  ;;  %s1274_s28 = int_to_ptr.vmem [resolvable:$false] %s1273_s28 }
 0x2e4   : > { %p1825_p1 = scmp.ne.s32.totalorder %s1823_s11, 0  ;;  %s1275_s14 = scalar_lea.vmem %s1274_s28, 512 }
 0x2e5   : > { %s1714_s24 = scalar_lea.hbm %s1824_s16, %s905_s9  ;;  %p1276_p0 = scmp.lt.s32.totalorder %s1709_s21, %s1274_s28 }
 0x2e6   : > { %p1271_p7 = pnand %p1270_p9, %p1825_p1  ;;  %p1277_p10 = scmp.lt.s32.totalorder %s1275_s14, %s1269_s5 }
 0x2e8   : > { %p1272_p8 = pneg %p1271_p7  ;;  %p1278_p12 = por %p1277_p10, %p1276_p0 }
 0x2ea   : > { %p1279_p13 = pnand %p1278_p12, %p1272_p8 }
 0x2ec   : > { %1282 = shalt.err (!%p1279_p13)
}
 0x2ed   : > { %s1283_s3 = scalar_lea.hbm %s1714_s24, 256  ;;  %s1287_s15 = scalar_lea.hbm %s1824_s16, 3072 }
 0x2ee   : > { %p1284_p2 = scmp.ne.s32.totalorder %s1714_s24, %s1283_s3  ;;  %p1288_p3 = scmp.lt.s32.totalorder %s1714_s24, %s1824_s16 }
 0x2ef   : > { %p1289_p6 = scmp.lt.s32.totalorder %s1287_s15, %s1283_s3 }
 0x2f0   : > { %p1285_p4 = pnand %p1284_p2, %p1825_p1 }
 0x2f1   : > { %p1290_p5 = por %p1289_p6, %p1288_p3 }
 0x2f2   : > { %p1286_p11 = pneg %p1285_p4 }
 0x2f4   : > { %p1291_p9 = pnand %p1290_p5, %p1286_p11 }
 0x2f6   : > { %1294 = shalt.err (!%p1291_p9)
}
 0x2f7   : > { %s1418_s17 = smov 128   ;;  %s1419_s18 = smov 384  }
 0x2f8   : > { %s1420_s9 = smov 8  }
 0x2f9   : > { %958 = dma.vmem_to_hbm [thread:$0]  (%p1825_p1), %s1709_s21, 256, %s1714_s24, %s1718_s2, %s1418_s17, %s1419_s18, %s1420_s9  }
 0x2fa PF: > { %s1826_s19 = sld [smem:[#allocation18_spill]]  ;;  %p990_p7 = scmp.ge.s32.totalorder %s1397_s7, 2 }
 0x2fb   : > { %s1827_s1 = sld [smem:[#allocation21_spill]] }
 0x300   : > { %s706_s5 = sand.u32 1, %s1826_s19  }
 0x301   : > { %p1828_p8 = scmp.ne.s32.totalorder %s1827_s1, 0  ;;  %s707_s27 = scalar_lea.sflag [#allocation6], %s706_s5 }
 0x303   : > { %p978_p0 = pnand %p990_p7, %p1828_p8 }
 0x305   : > { %p979_p10 = pneg %p978_p0 }
 0x307   : > { %1352 = dma.done.wait (%p979_p10), %s707_s27, 256  }
 0x308   : > { %1354 = vsyncadd (%p979_p10), %s707_s27, 4294967040  ;;  %s25_s7 = sadd.s32 1, %s1397_s7   ;;  %s1829_s27 = sld [smem:[#allocation19_spill]] }
 0x309   : > { %p22_p12 = scmp.ge.s32.totalorder %s25_s7, 14   ;;  %s1830_s11 = sld [smem:[#allocation22_spill]] }
 0x30a   : > { %s1831_s21 = smov %s1361_s22  ;;  %s1832_s22 = smov %s1365_s23 }
 0x30b   : > { %s1833_s23 = smov %s1617_s29  ;;  %s1834_s24 = smov %s1373_s25 }
 0x30c   : > { %s1835_s25 = smov %s1377_s26  ;;  %s1836_s26 = smov %s1612_s4 }
 0x30d   : > { %s1837_s28 = smov %s1393_s30  ;;  %s1839_s30 = smov %s1845_s20 }
 0x30e   :  { %24 = sbr.rel (!%p22_p12) target bundleno = 17 (0x11), region = 128 }
 0x30f   : > { %s1838_s29 = smov %s1830_s11 }
 0x313   :  { %719 = vsyncpa [#allocation5], 1 }
 0x314   :  { %721 = vsyncpa [#allocation5 + $0x1], 1 }
 0x315   :  { %722 = vsyncpa [#allocation8], 1 }
 0x316   :  { %723 = vsyncpa [#allocation11], 1 }
 0x317   :  { %724 = vsyncpa [#allocation6], 1 }
 0x318   :  { %726 = vsyncpa [#allocation6 + $0x1], 1 }

</bundles_post_ra>
